<compile_context>
chip_gen: v6e
topology: v6e:2x2x1
jax: 0.10.0
libtpu: 0.0.40
codegen_flags: <defaults>
</compile_context>

<pallas_src>
import functools
import math

import jax
import jax.numpy as jnp
from jax.experimental import pallas as pl
from jax.experimental.pallas import tpu as pltpu

LANE = 128


def _round_up(x, m):
    return (x + m - 1) // m * m


def _compiler_params(dimension_semantics, vmem_limit_bytes=None):
    cp_cls = getattr(pltpu, "CompilerParams", None)
    if cp_cls is None:  # older JAX releases
        cp_cls = getattr(pltpu, "TPUCompilerParams")
    kwargs = dict(dimension_semantics=dimension_semantics)
    if vmem_limit_bytes is not None:
        kwargs["vmem_limit_bytes"] = vmem_limit_bytes
    return cp_cls(**kwargs)


def _conv4x4s2_relu_kernel(y_ref, w_ref, b_ref, o_ref, *, tap_offsets):
    """One image x one Cout tile of Conv2d(4, stride=2, pad=1) + bias + ReLU.

    y_ref : (1, rows_in, K)   space-to-depth input, flat spatial, +1 zero row
    w_ref : (4, K, TN)        per-tap weight blocks, K ordered as (sh, sw, cin)
    b_ref : (1, TN)
    o_ref : (1, rows_out, TN) flat spatial = Hout x (Wout+1) (last col is garbage)
    """
    rows_out = o_ref.shape[1]
    tn = o_ref.shape[2]
    acc = jnp.zeros((rows_out, tn), dtype=jnp.float32)
    for t, off in enumerate(tap_offsets):          # 4 static taps -> 4 MXU matmuls
        xs = y_ref[0, off:off + rows_out, :]       # contiguous shifted slice (VMEM)
        acc = acc + jnp.dot(xs, w_ref[t], preferred_element_type=jnp.float32)
    acc = acc + b_ref[...].astype(jnp.float32)     # (1, TN) broadcasts over rows
    acc = jnp.maximum(acc, 0.0)                    # ReLU: free VPU filler
    o_ref[0, :, :] = acc.astype(o_ref.dtype)


def conv4x4s2_relu_nhwc(x, w, b):
    """Conv2d(kernel=4, stride=2, padding=1) + ReLU, channels-last.

    x : (B, H, W, Cin_pad) f32; channels >= w.shape[1] are zero padding.
    w : (Cout, Cin, 4, 4) PyTorch OIHW weights.     b : (Cout,)
    Returns (B, H//2, W//2, Cout_pad), Cout_pad = round_up(Cout, 128); the padded
    output channels are exactly zero so they can be carried into the next layer.
    """
    B, H, W, cin_pad = x.shape
    cout, cin, kh_, kw_ = w.shape
    assert (kh_, kw_) == (4, 4) and H % 2 == 0 and W % 2 == 0 and cin_pad >= cin

    hout, wout = H // 2, W // 2
    hp, wp = hout + 1, wout + 1              # space-to-depth spatial extents
    k = 4 * cin_pad                          # GEMM reduction size
    cout_pad = _round_up(cout, LANE)

    # ---- activation prep (pure layout ops, ~1x traffic; no im2col blow-up) ----
    xp = jnp.pad(x, ((0, 0), (1, 1), (1, 1), (0, 0)))                 # zero pad=1
    y = xp.reshape(B, hp, 2, wp, 2, cin_pad)
    y = jnp.transpose(y, (0, 1, 3, 2, 4, 5)).reshape(B, hp, wp, k)    # space->depth
    y = y.reshape(B, hp * wp, k)
    y = jnp.pad(y, ((0, 0), (0, 1), (0, 0)))   # +1 zero row keeps shifted slices
    rows_in = hp * wp + 1                      # in-bounds (only the garbage column
    rows_out = hout * wp                       # of each row ever touches it)

    # ---- weight prep (trace time, O(Cout*Cin*16)) ----
    wt = jnp.transpose(w, (2, 3, 1, 0))                    # (kh, kw, cin, cout)
    if cin_pad > cin:
        wt = jnp.pad(wt, ((0, 0), (0, 0), (0, cin_pad - cin), (0, 0)))
    wt = wt.reshape(2, 2, 2, 2, cin_pad, cout)             # (dh, sh, dw, sw, ci, co)
    wt = jnp.transpose(wt, (0, 2, 1, 3, 4, 5))             # (dh, dw, sh, sw, ci, co)
    wt = wt.reshape(4, k, cout)                            # tap t = 2*dh + dw
    if cout_pad > cout:
        wt = jnp.pad(wt, ((0, 0), (0, 0), (0, cout_pad - cout)))
        b = jnp.pad(b, (0, cout_pad - cout))
    b2 = b.reshape(1, cout_pad).astype(jnp.float32)

    # ---- Cout tiling: lane-dense tiles (multiples of 128) ----
    if cout_pad <= 512:
        tn = cout_pad
    elif cout_pad % 256 == 0:
        tn = 256
    else:
        tn = LANE
    n_ct = cout_pad // tn
    tap_offsets = (0, 1, wp, wp + 1)           # (dh, dw) -> dh*wp + dw

    flops = 2 * B * rows_out * cout_pad * k
    bytes_accessed = 4 * (y.size + B * wt.size + B * rows_out * cout_pad + cout_pad)
    cost = pl.CostEstimate(flops=flops, transcendentals=0,
                           bytes_accessed=bytes_accessed)

    out = pl.pallas_call(
        functools.partial(_conv4x4s2_relu_kernel, tap_offsets=tap_offsets),
        grid=(B, n_ct),
        in_specs=[
            pl.BlockSpec((1, rows_in, k), lambda bb, j: (bb, 0, 0)),
            pl.BlockSpec((4, k, tn), lambda bb, j: (0, 0, j)),
            pl.BlockSpec((1, tn), lambda bb, j: (0, j)),
        ],
        out_specs=pl.BlockSpec((1, rows_out, tn), lambda bb, j: (bb, 0, j)),
        out_shape=jax.ShapeDtypeStruct((B, rows_out, cout_pad), jnp.float32),
        compiler_params=_compiler_params(("parallel", "parallel"),
                                         vmem_limit_bytes=64 * 1024 * 1024),
        cost_estimate=cost,
    )(y, wt, b2)

    out = out.reshape(B, hout, wp, cout_pad)[:, :, :wout, :]   # drop garbage column
    return out


def n_maps(c, dim_h, n_channels):
    # Standard DCGAN doubling schedule (n_maps is not given in the spec).
    return n_channels if c == 0 else dim_h * 2 ** (c - 1)


def init_encoder_params(key, shape, dim_h, min_dim):
    """PyTorch Conv2d default init: U(-1/sqrt(fan_in), 1/sqrt(fan_in))."""
    n_conv = int(math.log(shape[2] / min_dim, 2))
    params = []
    for c in range(n_conv):
        cin = n_maps(c, dim_h, shape[1])
        cout = n_maps(c + 1, dim_h, shape[1])
        key, kw, kb = jax.random.split(key, 3)
        bound = 1.0 / math.sqrt(cin * 4 * 4)
        w = jax.random.uniform(kw, (cout, cin, 4, 4), jnp.float32, -bound, bound)
        bb = jax.random.uniform(kb, (cout,), jnp.float32, -bound, bound)
        params.append((w, bb))
    return params


@jax.jit
def encoder_forward(x_nchw, params):
    """Encoder.forward: [Conv2d(4,2,1) + ReLU] * n_conv, then View(-1, cat_size)
    in PyTorch NCHW flatten order."""
    # TODO(synk): batch_norm / dropout branches of conv_encoder are not implemented
    # (the module is exercised with batch_norm=False, dropout=False).
    x = jnp.transpose(x_nchw, (0, 2, 3, 1)).astype(jnp.float32)   # NCHW -> NHWC once
    for (w, bb) in params:
        x = conv4x4s2_relu_nhwc(x, w, bb)
    cout_true = params[-1][0].shape[0]
    x = x[..., :cout_true]                                        # drop padded chans
    x = jnp.transpose(x, (0, 3, 1, 2))                            # NHWC -> NCHW (tiny)
    return x.reshape(x.shape[0], -1)                              # View(-1, cat_size)


def _reference_forward(x_nchw, params):
    """Pure-JAX reference of the same forward pass (for a correctness check)."""
    x = x_nchw.astype(jnp.float32)
    for (w, bb) in params:
        x = jax.lax.conv_general_dilated(
            x, w, window_strides=(2, 2), padding=((1, 1), (1, 1)),
            dimension_numbers=("NCHW", "OIHW", "NCHW"))
        x = jnp.maximum(x + bb[None, :, None, None], 0.0)
    return x.reshape(x.shape[0], -1)


if __name__ == "__main__":
    # Encoder(shape=(2, 4, 16, 16), dim_h=32, batch_norm=False, dropout=False,
    #         'ReLU', min_dim=2)  -> 3 conv layers: 4->32->64->128, 16->8->4->2.
    shape = (2, 4, 16, 16)
    dim_h, min_dim = 32, 2

    key = jax.random.PRNGKey(0)
    key, kx = jax.random.split(key)
    x = jax.random.normal(kx, shape, jnp.float32)
    params = init_encoder_params(key, shape, dim_h, min_dim)

    out = encoder_forward(x, params)
    out = jax.block_until_ready(out)

    n_conv = int(math.log(shape[2] / min_dim, 2))
    cat_size = int(2 * (n_conv - 1) * dim_h
                   * (shape[2] / 2 ** n_conv) * (shape[3] / 2 ** n_conv))
    assert out.shape == (shape[0], cat_size), (out.shape, cat_size)

    ref = _reference_forward(x, params)
    err = float(jnp.max(jnp.abs(out - ref)))
    scale = float(jnp.max(jnp.abs(ref))) + 1e-6
    assert err <= 5e-2 * scale, f"kernel/reference mismatch: err={err}, scale={scale}"

    print("KERNEL_OK")
</pallas_src>

<mosaic_0001>
module attributes {stable_mosaic.version = 11 : i64} {
  func.func @_conv4x4s2_relu_kernel(%arg0: i32, %arg1: i32, %arg2: memref<1x82x16xf32, #tpu.memory_space<vmem>>, %arg3: memref<4x16x128xf32, #tpu.memory_space<vmem>>, %arg4: memref<1x128xf32, #tpu.memory_space<vmem>>, %arg5: memref<1x72x128xf32, #tpu.memory_space<vmem>>) attributes {dimension_semantics = [#tpu.dimension_semantics<parallel>, #tpu.dimension_semantics<parallel>], iteration_bounds = array<i64: 2, 1>, scalar_prefetch = 0 : i64, scratch_operands = 0 : i64, tpu.core_type = #tpu.core_type<tc>, window_params = [{transform_indices = @transform_0, window_bounds = array<i64: 1, 82, 16>}, {transform_indices = @transform_1, window_bounds = array<i64: 4, 16, 128>}, {transform_indices = @transform_2, window_bounds = array<i64: 1, 128>}, {transform_indices = @transform_3, window_bounds = array<i64: 1, 72, 128>}]} {
    %cst = arith.constant 0.000000e+00 : f32
    %0 = vector.broadcast %cst : f32 to vector<72x128xf32>
    %c0 = arith.constant 0 : index
    %c0_0 = arith.constant 0 : index
    %c0_1 = arith.constant 0 : index
    %1 = vector.load %arg2[%c0, %c0_0, %c0_1] : memref<1x82x16xf32, #tpu.memory_space<vmem>>, vector<1x72x16xf32>
    %2 = vector.shape_cast %1 : vector<1x72x16xf32> to vector<72x16xf32>
    %c0_2 = arith.constant 0 : index
    %c0_3 = arith.constant 0 : index
    %c0_4 = arith.constant 0 : index
    %3 = vector.load %arg3[%c0_2, %c0_3, %c0_4] : memref<4x16x128xf32, #tpu.memory_space<vmem>>, vector<1x16x128xf32>
    %4 = vector.shape_cast %3 : vector<1x16x128xf32> to vector<16x128xf32>
    %cst_5 = arith.constant dense<0.000000e+00> : vector<72x128xf32>
    %5 = tpu.matmul %2, %4, %cst_5 {dimension_numbers = #tpu.dot_dimension_numbers<[1], [0], [0], [1], [0, 0, 1, 1], [], []>} : vector<72x16xf32>, vector<16x128xf32>, vector<72x128xf32> -> vector<72x128xf32>
    %6 = arith.addf %0, %5 : vector<72x128xf32>
    %c0_6 = arith.constant 0 : index
    %c1 = arith.constant 1 : index
    %c0_7 = arith.constant 0 : index
    %7 = vector.load %arg2[%c0_6, %c1, %c0_7] : memref<1x82x16xf32, #tpu.memory_space<vmem>>, vector<1x72x16xf32>
    %8 = vector.shape_cast %7 : vector<1x72x16xf32> to vector<72x16xf32>
    %c1_8 = arith.constant 1 : index
    %c0_9 = arith.constant 0 : index
    %c0_10 = arith.constant 0 : index
    %9 = vector.load %arg3[%c1_8, %c0_9, %c0_10] : memref<4x16x128xf32, #tpu.memory_space<vmem>>, vector<1x16x128xf32>
    %10 = vector.shape_cast %9 : vector<1x16x128xf32> to vector<16x128xf32>
    %cst_11 = arith.constant dense<0.000000e+00> : vector<72x128xf32>
    %11 = tpu.matmul %8, %10, %cst_11 {dimension_numbers = #tpu.dot_dimension_numbers<[1], [0], [0], [1], [0, 0, 1, 1], [], []>} : vector<72x16xf32>, vector<16x128xf32>, vector<72x128xf32> -> vector<72x128xf32>
    %12 = arith.addf %6, %11 : vector<72x128xf32>
    %c0_12 = arith.constant 0 : index
    %c9 = arith.constant 9 : index
    %c0_13 = arith.constant 0 : index
    %13 = vector.load %arg2[%c0_12, %c9, %c0_13] : memref<1x82x16xf32, #tpu.memory_space<vmem>>, vector<1x72x16xf32>
    %14 = vector.shape_cast %13 : vector<1x72x16xf32> to vector<72x16xf32>
    %c2 = arith.constant 2 : index
    %c0_14 = arith.constant 0 : index
    %c0_15 = arith.constant 0 : index
    %15 = vector.load %arg3[%c2, %c0_14, %c0_15] : memref<4x16x128xf32, #tpu.memory_space<vmem>>, vector<1x16x128xf32>
    %16 = vector.shape_cast %15 : vector<1x16x128xf32> to vector<16x128xf32>
    %cst_16 = arith.constant dense<0.000000e+00> : vector<72x128xf32>
    %17 = tpu.matmul %14, %16, %cst_16 {dimension_numbers = #tpu.dot_dimension_numbers<[1], [0], [0], [1], [0, 0, 1, 1], [], []>} : vector<72x16xf32>, vector<16x128xf32>, vector<72x128xf32> -> vector<72x128xf32>
    %18 = arith.addf %12, %17 : vector<72x128xf32>
    %c0_17 = arith.constant 0 : index
    %c10 = arith.constant 10 : index
    %c0_18 = arith.constant 0 : index
    %19 = vector.load %arg2[%c0_17, %c10, %c0_18] : memref<1x82x16xf32, #tpu.memory_space<vmem>>, vector<1x72x16xf32>
    %20 = vector.shape_cast %19 : vector<1x72x16xf32> to vector<72x16xf32>
    %c3 = arith.constant 3 : index
    %c0_19 = arith.constant 0 : index
    %c0_20 = arith.constant 0 : index
    %21 = vector.load %arg3[%c3, %c0_19, %c0_20] : memref<4x16x128xf32, #tpu.memory_space<vmem>>, vector<1x16x128xf32>
    %22 = vector.shape_cast %21 : vector<1x16x128xf32> to vector<16x128xf32>
    %cst_21 = arith.constant dense<0.000000e+00> : vector<72x128xf32>
    %23 = tpu.matmul %20, %22, %cst_21 {dimension_numbers = #tpu.dot_dimension_numbers<[1], [0], [0], [1], [0, 0, 1, 1], [], []>} : vector<72x16xf32>, vector<16x128xf32>, vector<72x128xf32> -> vector<72x128xf32>
    %24 = arith.addf %18, %23 : vector<72x128xf32>
    %c0_22 = arith.constant 0 : index
    %c0_23 = arith.constant 0 : index
    %25 = vector.load %arg4[%c0_22, %c0_23] : memref<1x128xf32, #tpu.memory_space<vmem>>, vector<1x128xf32>
    %26 = vector.broadcast %25 : vector<1x128xf32> to vector<72x128xf32>
    %27 = arith.addf %24, %26 : vector<72x128xf32>
    %cst_24 = arith.constant 0.000000e+00 : f32
    %28 = vector.broadcast %cst_24 : f32 to vector<72x128xf32>
    %29 = arith.maximumf %27, %28 : vector<72x128xf32>
    %c0_25 = arith.constant 0 : index
    %c0_26 = arith.constant 0 : index
    %c0_27 = arith.constant 0 : index
    %30 = vector.load %arg5[%c0_25, %c0_26, %c0_27] : memref<1x72x128xf32, #tpu.memory_space<vmem>>, vector<1x72x128xf32>
    %31 = vector.shape_cast %30 : vector<1x72x128xf32> to vector<72x128xf32>
    %32 = vector.shape_cast %29 : vector<72x128xf32> to vector<1x72x128xf32>
    tpu.vector_store %arg5[%c0_25, %c0_26, %c0_27], %32 {strides = array<i32>} : memref<1x72x128xf32, #tpu.memory_space<vmem>>, vector<1x72x128xf32>,
    return
  }
  func.func @transform_0(%arg0: i32, %arg1: i32) -> (i32, i32, i32) {
    %c0_i32 = arith.constant 0 : i32
    %c0_i32_0 = arith.constant 0 : i32
    %c0_i32_1 = arith.constant 0 : i32
    return %arg0, %c0_i32, %c0_i32_0 : i32, i32, i32
  }
  func.func @transform_1(%arg0: i32, %arg1: i32) -> (i32, i32, i32) {
    %c0_i32 = arith.constant 0 : i32
    %c0_i32_0 = arith.constant 0 : i32
    %c0_i32_1 = arith.constant 0 : i32
    return %c0_i32, %c0_i32_0, %arg1 : i32, i32, i32
  }
  func.func @transform_2(%arg0: i32, %arg1: i32) -> (i32, i32) {
    %c0_i32 = arith.constant 0 : i32
    %c0_i32_0 = arith.constant 0 : i32
    return %c0_i32, %arg1 : i32, i32
  }
  func.func @transform_3(%arg0: i32, %arg1: i32) -> (i32, i32, i32) {
    %c0_i32 = arith.constant 0 : i32
    %c0_i32_0 = arith.constant 0 : i32
    return %arg0, %c0_i32, %arg1 : i32, i32, i32
  }
}

module attributes {stable_mosaic.version = 11 : i64} {
  func.func @_conv4x4s2_relu_kernel(%arg0: i32, %arg1: i32, %arg2: memref<1x26x512xf32, #tpu.memory_space<vmem>>, %arg3: memref<4x512x128xf32, #tpu.memory_space<vmem>>, %arg4: memref<1x128xf32, #tpu.memory_space<vmem>>, %arg5: memref<1x20x128xf32, #tpu.memory_space<vmem>>) attributes {dimension_semantics = [#tpu.dimension_semantics<parallel>, #tpu.dimension_semantics<parallel>], iteration_bounds = array<i64: 2, 1>, scalar_prefetch = 0 : i64, scratch_operands = 0 : i64, tpu.core_type = #tpu.core_type<tc>, window_params = [{transform_indices = @transform_0, window_bounds = array<i64: 1, 26, 512>}, {transform_indices = @transform_1, window_bounds = array<i64: 4, 512, 128>}, {transform_indices = @transform_2, window_bounds = array<i64: 1, 128>}, {transform_indices = @transform_3, window_bounds = array<i64: 1, 20, 128>}]} {
    %cst = arith.constant 0.000000e+00 : f32
    %0 = vector.broadcast %cst : f32 to vector<20x128xf32>
    %c0 = arith.constant 0 : index
    %c0_0 = arith.constant 0 : index
    %c0_1 = arith.constant 0 : index
    %1 = vector.load %arg2[%c0, %c0_0, %c0_1] : memref<1x26x512xf32, #tpu.memory_space<vmem>>, vector<1x20x512xf32>
    %2 = vector.shape_cast %1 : vector<1x20x512xf32> to vector<20x512xf32>
    %c0_2 = arith.constant 0 : index
    %c0_3 = arith.constant 0 : index
    %c0_4 = arith.constant 0 : index
    %3 = vector.load %arg3[%c0_2, %c0_3, %c0_4] : memref<4x512x128xf32, #tpu.memory_space<vmem>>, vector<1x512x128xf32>
    %4 = vector.shape_cast %3 : vector<1x512x128xf32> to vector<512x128xf32>
    %cst_5 = arith.constant dense<0.000000e+00> : vector<20x128xf32>
    %5 = tpu.matmul %2, %4, %cst_5 {dimension_numbers = #tpu.dot_dimension_numbers<[1], [0], [0], [1], [0, 0, 1, 1], [], []>} : vector<20x512xf32>, vector<512x128xf32>, vector<20x128xf32> -> vector<20x128xf32>
    %6 = arith.addf %0, %5 : vector<20x128xf32>
    %c0_6 = arith.constant 0 : index
    %c1 = arith.constant 1 : index
    %c0_7 = arith.constant 0 : index
    %7 = vector.load %arg2[%c0_6, %c1, %c0_7] : memref<1x26x512xf32, #tpu.memory_space<vmem>>, vector<1x20x512xf32>
    %8 = vector.shape_cast %7 : vector<1x20x512xf32> to vector<20x512xf32>
    %c1_8 = arith.constant 1 : index
    %c0_9 = arith.constant 0 : index
    %c0_10 = arith.constant 0 : index
    %9 = vector.load %arg3[%c1_8, %c0_9, %c0_10] : memref<4x512x128xf32, #tpu.memory_space<vmem>>, vector<1x512x128xf32>
    %10 = vector.shape_cast %9 : vector<1x512x128xf32> to vector<512x128xf32>
    %cst_11 = arith.constant dense<0.000000e+00> : vector<20x128xf32>
    %11 = tpu.matmul %8, %10, %cst_11 {dimension_numbers = #tpu.dot_dimension_numbers<[1], [0], [0], [1], [0, 0, 1, 1], [], []>} : vector<20x512xf32>, vector<512x128xf32>, vector<20x128xf32> -> vector<20x128xf32>
    %12 = arith.addf %6, %11 : vector<20x128xf32>
    %c0_12 = arith.constant 0 : index
    %c5 = arith.constant 5 : index
    %c0_13 = arith.constant 0 : index
    %13 = vector.load %arg2[%c0_12, %c5, %c0_13] : memref<1x26x512xf32, #tpu.memory_space<vmem>>, vector<1x20x512xf32>
    %14 = vector.shape_cast %13 : vector<1x20x512xf32> to vector<20x512xf32>
    %c2 = arith.constant 2 : index
    %c0_14 = arith.constant 0 : index
    %c0_15 = arith.constant 0 : index
    %15 = vector.load %arg3[%c2, %c0_14, %c0_15] : memref<4x512x128xf32, #tpu.memory_space<vmem>>, vector<1x512x128xf32>
    %16 = vector.shape_cast %15 : vector<1x512x128xf32> to vector<512x128xf32>
    %cst_16 = arith.constant dense<0.000000e+00> : vector<20x128xf32>
    %17 = tpu.matmul %14, %16, %cst_16 {dimension_numbers = #tpu.dot_dimension_numbers<[1], [0], [0], [1], [0, 0, 1, 1], [], []>} : vector<20x512xf32>, vector<512x128xf32>, vector<20x128xf32> -> vector<20x128xf32>
    %18 = arith.addf %12, %17 : vector<20x128xf32>
    %c0_17 = arith.constant 0 : index
    %c6 = arith.constant 6 : index
    %c0_18 = arith.constant 0 : index
    %19 = vector.load %arg2[%c0_17, %c6, %c0_18] : memref<1x26x512xf32, #tpu.memory_space<vmem>>, vector<1x20x512xf32>
    %20 = vector.shape_cast %19 : vector<1x20x512xf32> to vector<20x512xf32>
    %c3 = arith.constant 3 : index
    %c0_19 = arith.constant 0 : index
    %c0_20 = arith.constant 0 : index
    %21 = vector.load %arg3[%c3, %c0_19, %c0_20] : memref<4x512x128xf32, #tpu.memory_space<vmem>>, vector<1x512x128xf32>
    %22 = vector.shape_cast %21 : vector<1x512x128xf32> to vector<512x128xf32>
    %cst_21 = arith.constant dense<0.000000e+00> : vector<20x128xf32>
    %23 = tpu.matmul %20, %22, %cst_21 {dimension_numbers = #tpu.dot_dimension_numbers<[1], [0], [0], [1], [0, 0, 1, 1], [], []>} : vector<20x512xf32>, vector<512x128xf32>, vector<20x128xf32> -> vector<20x128xf32>
    %24 = arith.addf %18, %23 : vector<20x128xf32>
    %c0_22 = arith.constant 0 : index
    %c0_23 = arith.constant 0 : index
    %25 = vector.load %arg4[%c0_22, %c0_23] : memref<1x128xf32, #tpu.memory_space<vmem>>, vector<1x128xf32>
    %26 = vector.broadcast %25 : vector<1x128xf32> to vector<20x128xf32>
    %27 = arith.addf %24, %26 : vector<20x128xf32>
    %cst_24 = arith.constant 0.000000e+00 : f32
    %28 = vector.broadcast %cst_24 : f32 to vector<20x128xf32>
    %29 = arith.maximumf %27, %28 : vector<20x128xf32>
    %c0_25 = arith.constant 0 : index
    %c0_26 = arith.constant 0 : index
    %c0_27 = arith.constant 0 : index
    %30 = vector.load %arg5[%c0_25, %c0_26, %c0_27] : memref<1x20x128xf32, #tpu.memory_space<vmem>>, vector<1x20x128xf32>
    %31 = vector.shape_cast %30 : vector<1x20x128xf32> to vector<20x128xf32>
    %32 = vector.shape_cast %29 : vector<20x128xf32> to vector<1x20x128xf32>
    tpu.vector_store %arg5[%c0_25, %c0_26, %c0_27], %32 {strides = array<i32>} : memref<1x20x128xf32, #tpu.memory_space<vmem>>, vector<1x20x128xf32>,
    return
  }
  func.func @transform_0(%arg0: i32, %arg1: i32) -> (i32, i32, i32) {
    %c0_i32 = arith.constant 0 : i32
    %c0_i32_0 = arith.constant 0 : i32
    %c0_i32_1 = arith.constant 0 : i32
    return %arg0, %c0_i32, %c0_i32_0 : i32, i32, i32
  }
  func.func @transform_1(%arg0: i32, %arg1: i32) -> (i32, i32, i32) {
    %c0_i32 = arith.constant 0 : i32
    %c0_i32_0 = arith.constant 0 : i32
    %c0_i32_1 = arith.constant 0 : i32
    return %c0_i32, %c0_i32_0, %arg1 : i32, i32, i32
  }
  func.func @transform_2(%arg0: i32, %arg1: i32) -> (i32, i32) {
    %c0_i32 = arith.constant 0 : i32
    %c0_i32_0 = arith.constant 0 : i32
    return %c0_i32, %arg1 : i32, i32
  }
  func.func @transform_3(%arg0: i32, %arg1: i32) -> (i32, i32, i32) {
    %c0_i32 = arith.constant 0 : i32
    %c0_i32_0 = arith.constant 0 : i32
    return %arg0, %c0_i32, %arg1 : i32, i32, i32
  }
}

module attributes {stable_mosaic.version = 11 : i64} {
  func.func @_conv4x4s2_relu_kernel(%arg0: i32, %arg1: i32, %arg2: memref<1x10x512xf32, #tpu.memory_space<vmem>>, %arg3: memref<4x512x128xf32, #tpu.memory_space<vmem>>, %arg4: memref<1x128xf32, #tpu.memory_space<vmem>>, %arg5: memref<1x6x128xf32, #tpu.memory_space<vmem>>) attributes {dimension_semantics = [#tpu.dimension_semantics<parallel>, #tpu.dimension_semantics<parallel>], iteration_bounds = array<i64: 2, 1>, scalar_prefetch = 0 : i64, scratch_operands = 0 : i64, tpu.core_type = #tpu.core_type<tc>, window_params = [{transform_indices = @transform_0, window_bounds = array<i64: 1, 10, 512>}, {transform_indices = @transform_1, window_bounds = array<i64: 4, 512, 128>}, {transform_indices = @transform_2, window_bounds = array<i64: 1, 128>}, {transform_indices = @transform_3, window_bounds = array<i64: 1, 6, 128>}]} {
    %cst = arith.constant 0.000000e+00 : f32
    %0 = vector.broadcast %cst : f32 to vector<6x128xf32>
    %c0 = arith.constant 0 : index
    %c0_0 = arith.constant 0 : index
    %c0_1 = arith.constant 0 : index
    %1 = vector.load %arg2[%c0, %c0_0, %c0_1] : memref<1x10x512xf32, #tpu.memory_space<vmem>>, vector<1x6x512xf32>
    %2 = vector.shape_cast %1 : vector<1x6x512xf32> to vector<6x512xf32>
    %c0_2 = arith.constant 0 : index
    %c0_3 = arith.constant 0 : index
    %c0_4 = arith.constant 0 : index
    %3 = vector.load %arg3[%c0_2, %c0_3, %c0_4] : memref<4x512x128xf32, #tpu.memory_space<vmem>>, vector<1x512x128xf32>
    %4 = vector.shape_cast %3 : vector<1x512x128xf32> to vector<512x128xf32>
    %cst_5 = arith.constant dense<0.000000e+00> : vector<6x128xf32>
    %5 = tpu.matmul %2, %4, %cst_5 {dimension_numbers = #tpu.dot_dimension_numbers<[1], [0], [0], [1], [0, 0, 1, 1], [], []>} : vector<6x512xf32>, vector<512x128xf32>, vector<6x128xf32> -> vector<6x128xf32>
    %6 = arith.addf %0, %5 : vector<6x128xf32>
    %c0_6 = arith.constant 0 : index
    %c1 = arith.constant 1 : index
    %c0_7 = arith.constant 0 : index
    %7 = vector.load %arg2[%c0_6, %c1, %c0_7] : memref<1x10x512xf32, #tpu.memory_space<vmem>>, vector<1x6x512xf32>
    %8 = vector.shape_cast %7 : vector<1x6x512xf32> to vector<6x512xf32>
    %c1_8 = arith.constant 1 : index
    %c0_9 = arith.constant 0 : index
    %c0_10 = arith.constant 0 : index
    %9 = vector.load %arg3[%c1_8, %c0_9, %c0_10] : memref<4x512x128xf32, #tpu.memory_space<vmem>>, vector<1x512x128xf32>
    %10 = vector.shape_cast %9 : vector<1x512x128xf32> to vector<512x128xf32>
    %cst_11 = arith.constant dense<0.000000e+00> : vector<6x128xf32>
    %11 = tpu.matmul %8, %10, %cst_11 {dimension_numbers = #tpu.dot_dimension_numbers<[1], [0], [0], [1], [0, 0, 1, 1], [], []>} : vector<6x512xf32>, vector<512x128xf32>, vector<6x128xf32> -> vector<6x128xf32>
    %12 = arith.addf %6, %11 : vector<6x128xf32>
    %c0_12 = arith.constant 0 : index
    %c3 = arith.constant 3 : index
    %c0_13 = arith.constant 0 : index
    %13 = vector.load %arg2[%c0_12, %c3, %c0_13] : memref<1x10x512xf32, #tpu.memory_space<vmem>>, vector<1x6x512xf32>
    %14 = vector.shape_cast %13 : vector<1x6x512xf32> to vector<6x512xf32>
    %c2 = arith.constant 2 : index
    %c0_14 = arith.constant 0 : index
    %c0_15 = arith.constant 0 : index
    %15 = vector.load %arg3[%c2, %c0_14, %c0_15] : memref<4x512x128xf32, #tpu.memory_space<vmem>>, vector<1x512x128xf32>
    %16 = vector.shape_cast %15 : vector<1x512x128xf32> to vector<512x128xf32>
    %cst_16 = arith.constant dense<0.000000e+00> : vector<6x128xf32>
    %17 = tpu.matmul %14, %16, %cst_16 {dimension_numbers = #tpu.dot_dimension_numbers<[1], [0], [0], [1], [0, 0, 1, 1], [], []>} : vector<6x512xf32>, vector<512x128xf32>, vector<6x128xf32> -> vector<6x128xf32>
    %18 = arith.addf %12, %17 : vector<6x128xf32>
    %c0_17 = arith.constant 0 : index
    %c4 = arith.constant 4 : index
    %c0_18 = arith.constant 0 : index
    %19 = vector.load %arg2[%c0_17, %c4, %c0_18] : memref<1x10x512xf32, #tpu.memory_space<vmem>>, vector<1x6x512xf32>
    %20 = vector.shape_cast %19 : vector<1x6x512xf32> to vector<6x512xf32>
    %c3_19 = arith.constant 3 : index
    %c0_20 = arith.constant 0 : index
    %c0_21 = arith.constant 0 : index
    %21 = vector.load %arg3[%c3_19, %c0_20, %c0_21] : memref<4x512x128xf32, #tpu.memory_space<vmem>>, vector<1x512x128xf32>
    %22 = vector.shape_cast %21 : vector<1x512x128xf32> to vector<512x128xf32>
    %cst_22 = arith.constant dense<0.000000e+00> : vector<6x128xf32>
    %23 = tpu.matmul %20, %22, %cst_22 {dimension_numbers = #tpu.dot_dimension_numbers<[1], [0], [0], [1], [0, 0, 1, 1], [], []>} : vector<6x512xf32>, vector<512x128xf32>, vector<6x128xf32> -> vector<6x128xf32>
    %24 = arith.addf %18, %23 : vector<6x128xf32>
    %c0_23 = arith.constant 0 : index
    %c0_24 = arith.constant 0 : index
    %25 = vector.load %arg4[%c0_23, %c0_24] : memref<1x128xf32, #tpu.memory_space<vmem>>, vector<1x128xf32>
    %26 = vector.broadcast %25 : vector<1x128xf32> to vector<6x128xf32>
    %27 = arith.addf %24, %26 : vector<6x128xf32>
    %cst_25 = arith.constant 0.000000e+00 : f32
    %28 = vector.broadcast %cst_25 : f32 to vector<6x128xf32>
    %29 = arith.maximumf %27, %28 : vector<6x128xf32>
    %c0_26 = arith.constant 0 : index
    %c0_27 = arith.constant 0 : index
    %c0_28 = arith.constant 0 : index
    %30 = vector.load %arg5[%c0_26, %c0_27, %c0_28] : memref<1x6x128xf32, #tpu.memory_space<vmem>>, vector<1x6x128xf32>
    %31 = vector.shape_cast %30 : vector<1x6x128xf32> to vector<6x128xf32>
    %32 = vector.shape_cast %29 : vector<6x128xf32> to vector<1x6x128xf32>
    tpu.vector_store %arg5[%c0_26, %c0_27, %c0_28], %32 {strides = array<i32>} : memref<1x6x128xf32, #tpu.memory_space<vmem>>, vector<1x6x128xf32>,
    return
  }
  func.func @transform_0(%arg0: i32, %arg1: i32) -> (i32, i32, i32) {
    %c0_i32 = arith.constant 0 : i32
    %c0_i32_0 = arith.constant 0 : i32
    %c0_i32_1 = arith.constant 0 : i32
    return %arg0, %c0_i32, %c0_i32_0 : i32, i32, i32
  }
  func.func @transform_1(%arg0: i32, %arg1: i32) -> (i32, i32, i32) {
    %c0_i32 = arith.constant 0 : i32
    %c0_i32_0 = arith.constant 0 : i32
    %c0_i32_1 = arith.constant 0 : i32
    return %c0_i32, %c0_i32_0, %arg1 : i32, i32, i32
  }
  func.func @transform_2(%arg0: i32, %arg1: i32) -> (i32, i32) {
    %c0_i32 = arith.constant 0 : i32
    %c0_i32_0 = arith.constant 0 : i32
    return %c0_i32, %arg1 : i32, i32
  }
  func.func @transform_3(%arg0: i32, %arg1: i32) -> (i32, i32, i32) {
    %c0_i32 = arith.constant 0 : i32
    %c0_i32_0 = arith.constant 0 : i32
    return %arg0, %c0_i32, %arg1 : i32, i32, i32
  }
}

</mosaic_0001>

<bundles_post_ra>
// kernel: encoder_forward.3
= control target key start
LH: loop header
LB: loop body
LE: loop exit
PB: predicated region body
PF: predicated region fallthrough
CT: control target
= control target key end

     0   :  { %s1271_s12 = smov 0   ;;  %s1273_s13 = smov 0   ;;  %s1524_s0 = inlined_call_operand.vmem [shape: f32[2,82,16], index: 0, kind: input, shape index: {}]   ;;  %s1525_s1 = inlined_call_operand.vmem [shape: f32[4,16,128], index: 1, kind: input, shape index: {}]   ;;  %s1526_s2 = inlined_call_operand.vmem [shape: f32[1,128], index: 2, kind: input, shape index: {}]   ;;  %s1527_s3 = inlined_call_operand.vmem [shape: f32[2,72,128], index: 3, kind: output, shape index: {}]  }
   0x1   :  { %s1275_s14 = smov 0  }
   0x2 LB: > { %s25_s15 = sadd.s32 1, %s1243_s13  ;;  %p981_p0 = scmp.ge.s32.totalorder %s1247_s14, 1  ;;  %s1247_s14 = sphi %s1275_s14, %s13_s14   ;;  %s1243_s13 = sphi %s1273_s13, %s1529_s13   ;;  %s1239_s12 = sphi %s1271_s12, %s1528_s12  }
   0x3   : > { %p27_p1 = scmp.ge.s32.totalorder %s25_s15, 2  ;;  %p168_p2 = scmp.lt.s32.totalorder %s1247_s14, 3 }
   0x5   : > { %s1531_s15 = smov (%p27_p1, %s25_s15), 0  ;;  %p169_p3 = pnand %p981_p0, %p168_p2 }
   0x6   : > { %p202_p4 = scmp.lt.s32.totalorder (!%p169_p3), %s1239_s12, 1 }
   0x7   : > { %172 = sbr.rel (%p169_p3) target bundleno = 289 (0x121), region = 32 }
   0xc   : > { %v985_v0 = vld [vmem:[%s1525_s1 + $0x18] sm:$0xff]  ;;  %v232_v1 = vld [vmem:[%s1525_s1 + $0x8] sm:$0xff]  ;;  %v1249_v2 = vmov 0.0   ;;  %v984_v3 = vld [vmem:[%s1525_s1 + $0x10] sm:$0xff]  ;;  %s1533_s12 = smov (!%p202_p4, %s1239_s12), 1  ;;  %vm1250_vm0 = vmmov 0  }
   0xd   : > { %1073 = vmatprep.subr.mxu0 %v1249_v2  ;;  %1104 = vmatprep.subr.mxu1 %v1249_v2  ;;  %v231_v4 = vld [vmem:[%s1525_s1] sm:$0xff]  ;;  %s1197_s24 = smul.u32 88, %s1533_s12  ;;  %vm245_vm1 = vcmask 130048   ;;  %v1005_v5 = vld [vmem:[%s1525_s1 + $0x28] sm:$0xff]  ;;  %v1016_v6 = vld [vmem:[%s1525_s1 + $0x38] sm:$0xff] }
   0xe   : > { %1074 = vmatpush3.msra.mxu0 %v985_v0  ;;  %1105 = vmatpush3.msra.mxu1 %v232_v1  ;;  %v1004_v11 = vld [vmem:[%s1525_s1 + $0x20] sm:$0xff]  ;;  %v1015_v12 = vld [vmem:[%s1525_s1 + $0x30] sm:$0xff]  ;;  %s1198_s9 = smul.u32 72, %s1533_s12 }
   0xf   : > { %1075 = vmatprep.subr.mxu0 %v1249_v2  ;;  %1106 = vmatprep.subr.mxu1 %v1249_v2  ;;  %s1316_s27 = scalar_lea.vmem %s1524_s0, %s1197_s24 }
  0x10   : > { %1076 = vmatpush3.msra.mxu0 %v984_v3  ;;  %1077 = vmatprep.mubr.msk.f32.mxu0 %vm1250_vm0, %v1249_v2  ;;  %v233_v7 = vld [vmem:[%s1316_s27 + $0x1] sm:$0xff]  ;;  %v234_v9 = vld [vmem:[%s1316_s27 + $0x9] sm:$0xff]  ;;  %v235_v13 = vld [vmem:[%s1316_s27 + $0x11] sm:$0xff]  ;;  %s1489_s18 = scalar_lea.vmem %s1527_s3, %s1198_s9 }
  0x11   : > { %1107 = vmatpush3.msra.mxu1 %v231_v4  ;;  %1108 = vmatprep.mubr.msk.f32.mxu1 %vm1250_vm0, %v1249_v2  ;;  %v222_v8 = vld [vmem:[%s1316_s27] sm:$0xff]  ;;  %v223_v10 = vld [vmem:[%s1316_s27 + $0x8] sm:$0xff]  ;;  %v224_v14 = vld [vmem:[%s1316_s27 + $0x10] sm:$0xff] }
  0x12   : > { %1135 = vmatprep.subr.mxu0 %v1249_v2  ;;  %1166 = vmatprep.subr.mxu1 %v1249_v2  ;;  %v236_v15 = vld [vmem:[%s1316_s27 + $0x19] sm:$0xff]  ;;  %v237_v17 = vld [vmem:[%s1316_s27 + $0x21] sm:$0xff]  ;;  %v238_v19 = vld [vmem:[%s1316_s27 + $0x29] sm:$0xff] }
  0x13   : > { %1078 = vmatmul.mubr.msk.f32.vlgmr.msra.gmra.mxu0 %vm245_vm1, %v233_v7  ;;  %1109 = vmatmul.mubr.msk.f32.vlgmr.msra.gmra.mxu1 %vm245_vm1, %v222_v8  ;;  %v225_v16 = vld [vmem:[%s1316_s27 + $0x18] sm:$0xff]  ;;  %v226_v18 = vld [vmem:[%s1316_s27 + $0x20] sm:$0xff]  ;;  %v227_v20 = vld [vmem:[%s1316_s27 + $0x28] sm:$0xff] }
  0x14   : > { %1136 = vmatpush3.msra.mxu0 %v1005_v5  ;;  %1167 = vmatpush3.msra.mxu1 %v1016_v6  ;;  %v239_v21 = vld [vmem:[%s1316_s27 + $0x31] sm:$0xff]  ;;  %v240_v23 = vld [vmem:[%s1316_s27 + $0x39] sm:$0xff]  ;;  %v241_v25 = vld [vmem:[%s1316_s27 + $0x41] sm:$0xff] }
  0x15   : > { %1080 = vmatprep.mubr.msk.f32.mxu0 %vm1250_vm0, %v1249_v2  ;;  %1111 = vmatprep.mubr.msk.f32.mxu1 %vm1250_vm0, %v1249_v2  ;;  %v228_v22 = vld [vmem:[%s1316_s27 + $0x30] sm:$0xff]  ;;  %v229_v24 = vld [vmem:[%s1316_s27 + $0x38] sm:$0xff]  ;;  %v230_v26 = vld [vmem:[%s1316_s27 + $0x40] sm:$0xff] }
  0x16   : > { %1137 = vmatprep.subr.mxu0 %v1249_v2  ;;  %1168 = vmatprep.subr.mxu1 %v1249_v2  ;;  %v678_v27 = vld [vmem:[%s1316_s27 + $0xa] sm:$0xff]  ;;  %v679_v28 = vld [vmem:[%s1316_s27 + $0x12] sm:$0xff]  ;;  %v680_v29 = vld [vmem:[%s1316_s27 + $0x1a] sm:$0xff] }
  0x17   : > { %1081 = vmatmul.mubr.msk.f32.gmra.mxu0 %vm245_vm1, %v234_v9  ;;  %1112 = vmatmul.mubr.msk.f32.gmra.mxu1 %vm245_vm1, %v223_v10  ;;  %v681_v30 = vld [vmem:[%s1316_s27 + $0x22] sm:$0xff]  ;;  %v682_v31 = vld [vmem:[%s1316_s27 + $0x2a] sm:$0xff]  ;;  %v683_v32 = vld [vmem:[%s1316_s27 + $0x32] sm:$0xff] }
  0x18   : > { %1083 = vmatprep.mubr.msk.f32.mxu0 %vm1250_vm0, %v1249_v2  ;;  %1114 = vmatprep.mubr.msk.f32.mxu1 %vm1250_vm0, %v1249_v2  ;;  %v684_v33 = vld [vmem:[%s1316_s27 + $0x3a] sm:$0xff]  ;;  %v685_v34 = vld [vmem:[%s1316_s27 + $0x42] sm:$0xff]  ;;  %v686_v36 = vld [vmem:[%s1316_s27 + $0x4a] sm:$0xff] }
  0x19   : > { %1138 = vmatpush3.msra.mxu0 %v1004_v11  ;;  %1169 = vmatpush3.msra.mxu1 %v1015_v12  ;;  %v528_v35 = vld [vmem:[%s1316_s27 + $0x49] sm:$0xff] }
  0x1b   : > { %1084 = vmatmul.mubr.msk.f32.gmra.mxu0 %vm245_vm1, %v235_v13  ;;  %1115 = vmatmul.mubr.msk.f32.gmra.mxu1 %vm245_vm1, %v224_v14 }
  0x1c   : > { %1086 = vmatprep.mubr.msk.f32.mxu0 %vm1250_vm0, %v1249_v2  ;;  %1117 = vmatprep.mubr.msk.f32.mxu1 %vm1250_vm0, %v1249_v2 }
  0x1f   : > { %1087 = vmatmul.mubr.msk.f32.gmra.mxu0 %vm245_vm1, %v236_v15  ;;  %1118 = vmatmul.mubr.msk.f32.gmra.mxu1 %vm245_vm1, %v225_v16 }
  0x20   : > { %1089 = vmatprep.mubr.msk.f32.mxu0 %vm1250_vm0, %v1249_v2  ;;  %1120 = vmatprep.mubr.msk.f32.mxu1 %vm1250_vm0, %v1249_v2 }
  0x23   : > { %1090 = vmatmul.mubr.msk.f32.gmra.mxu0 %vm245_vm1, %v237_v17  ;;  %1121 = vmatmul.mubr.msk.f32.gmra.mxu1 %vm245_vm1, %v226_v18 }
  0x24   : > { %1092 = vmatprep.mubr.msk.f32.mxu0 %vm1250_vm0, %v1249_v2  ;;  %1123 = vmatprep.mubr.msk.f32.mxu1 %vm1250_vm0, %v1249_v2 }
  0x27   : > { %1093 = vmatmul.mubr.msk.f32.gmra.mxu0 %vm245_vm1, %v238_v19  ;;  %1124 = vmatmul.mubr.msk.f32.gmra.mxu1 %vm245_vm1, %v227_v20 }
  0x28   : > { %1095 = vmatprep.mubr.msk.f32.mxu0 %vm1250_vm0, %v1249_v2  ;;  %1126 = vmatprep.mubr.msk.f32.mxu1 %vm1250_vm0, %v1249_v2 }
  0x2b   : > { %1096 = vmatmul.mubr.msk.f32.gmra.mxu0 %vm245_vm1, %v239_v21  ;;  %1127 = vmatmul.mubr.msk.f32.gmra.mxu1 %vm245_vm1, %v228_v22 }
  0x2c   : > { %1098 = vmatprep.mubr.msk.f32.mxu0 %vm1250_vm0, %v1249_v2  ;;  %1129 = vmatprep.mubr.msk.f32.mxu1 %vm1250_vm0, %v1249_v2 }
  0x2f   : > { %1099 = vmatmul.mubr.msk.f32.gmra.mxu0 %vm245_vm1, %v240_v23  ;;  %1130 = vmatmul.mubr.msk.f32.gmra.mxu1 %vm245_vm1, %v229_v24 }
  0x30   : > { %1101 = vmatprep.mubr.msk.f32.mxu0 %vm1250_vm0, %v1249_v2  ;;  %1132 = vmatprep.mubr.msk.f32.mxu1 %vm1250_vm0, %v1249_v2 }
  0x33   : > { %1102 = vmatmul.mubr.msk.f32.gmra.mxu0 %vm245_vm1, %v241_v25  ;;  %1133 = vmatmul.mubr.msk.f32.gmra.mxu1 %vm245_vm1, %v230_v26 }
  0x34   : > { %1139 = vmatprep.mubr.msk.f32.mxu0 %vm1250_vm0, %v1249_v2  ;;  %1170 = vmatprep.mubr.msk.f32.mxu1 %vm1250_vm0, %v1249_v2 }
  0x37   : > { %1140 = vmatmul.mubr.msk.f32.vlgmr.msra.gmra.mxu0 %vm245_vm1, %v234_v9  ;;  %1171 = vmatmul.mubr.msk.f32.vlgmr.msra.gmra.mxu1 %vm245_vm1, %v678_v27 }
  0x38   : > { %1142 = vmatprep.mubr.msk.f32.mxu0 %vm1250_vm0, %v1249_v2  ;;  %1173 = vmatprep.mubr.msk.f32.mxu1 %vm1250_vm0, %v1249_v2 }
  0x3b   : > { %1143 = vmatmul.mubr.msk.f32.gmra.mxu0 %vm245_vm1, %v235_v13  ;;  %1174 = vmatmul.mubr.msk.f32.gmra.mxu1 %vm245_vm1, %v679_v28  ;;  %v1483_v13 = vld [vmem:[%s1526_s2] ss:$0 sm:$0xff] }
  0x3c   : > { %1145 = vmatprep.mubr.msk.f32.mxu0 %vm1250_vm0, %v1249_v2  ;;  %1176 = vmatprep.mubr.msk.f32.mxu1 %vm1250_vm0, %v1249_v2 }
  0x3f   : > { %1146 = vmatmul.mubr.msk.f32.gmra.mxu0 %vm245_vm1, %v236_v15  ;;  %1177 = vmatmul.mubr.msk.f32.gmra.mxu1 %vm245_vm1, %v680_v29 }
  0x40   : > { %1148 = vmatprep.mubr.msk.f32.mxu0 %vm1250_vm0, %v1249_v2  ;;  %1179 = vmatprep.mubr.msk.f32.mxu1 %vm1250_vm0, %v1249_v2 }
  0x43   : > { %1149 = vmatmul.mubr.msk.f32.gmra.mxu0 %vm245_vm1, %v237_v17  ;;  %1180 = vmatmul.mubr.msk.f32.gmra.mxu1 %vm245_vm1, %v681_v30 }
  0x44   : > { %1151 = vmatprep.mubr.msk.f32.mxu0 %vm1250_vm0, %v1249_v2  ;;  %1182 = vmatprep.mubr.msk.f32.mxu1 %vm1250_vm0, %v1249_v2 }
  0x47   : > { %1152 = vmatmul.mubr.msk.f32.gmra.mxu0 %vm245_vm1, %v238_v19  ;;  %1183 = vmatmul.mubr.msk.f32.gmra.mxu1 %vm245_vm1, %v682_v31 }
  0x48   : > { %1154 = vmatprep.mubr.msk.f32.mxu0 %vm1250_vm0, %v1249_v2  ;;  %1185 = vmatprep.mubr.msk.f32.mxu1 %vm1250_vm0, %v1249_v2 }
  0x4b   : > { %1155 = vmatmul.mubr.msk.f32.gmra.mxu0 %vm245_vm1, %v239_v21  ;;  %1186 = vmatmul.mubr.msk.f32.gmra.mxu1 %vm245_vm1, %v683_v32 }
  0x4c   : > { %1157 = vmatprep.mubr.msk.f32.mxu0 %vm1250_vm0, %v1249_v2  ;;  %1188 = vmatprep.mubr.msk.f32.mxu1 %vm1250_vm0, %v1249_v2 }
  0x4f   : > { %1158 = vmatmul.mubr.msk.f32.gmra.mxu0 %vm245_vm1, %v240_v23  ;;  %1189 = vmatmul.mubr.msk.f32.gmra.mxu1 %vm245_vm1, %v684_v33 }
  0x50   : > { %1160 = vmatprep.mubr.msk.f32.mxu0 %vm1250_vm0, %v1249_v2  ;;  %1191 = vmatprep.mubr.msk.f32.mxu1 %vm1250_vm0, %v1249_v2 }
  0x53   : > { %1161 = vmatmul.mubr.msk.f32.gmra.mxu0 %vm245_vm1, %v241_v25  ;;  %1192 = vmatmul.mubr.msk.f32.gmra.mxu1 %vm245_vm1, %v685_v34 }
  0x54   : > { %1163 = vmatprep.mubr.msk.f32.mxu0 %vm1250_vm0, %v1249_v2  ;;  %1194 = vmatprep.mubr.msk.f32.mxu1 %vm1250_vm0, %v1249_v2 }
  0x57   : > { %1164 = vmatmul.mubr.msk.f32.gmra.mxu0 %vm245_vm1, %v528_v35  ;;  %1195 = vmatmul.mubr.msk.f32.gmra.mxu1 %vm245_vm1, %v686_v36 }
  0xd3   : > { %v339_v37 = vpop.f32.mrf.mxu0  ;;  %v476_v38 = vpop.f32.mrf.mxu1 }
  0xd4   : > { %v477_v9 = vadd.f32 %v476_v38, %v339_v37 }
  0xd5   : > { %v1079_v39 = vpop.f32.mrf.mxu0  ;;  %v1110_v40 = vpop.f32.mrf.mxu1 }
  0xd7   : > { %v344_v41 = vpop.f32.mrf.mxu0  ;;  %v481_v42 = vpop.f32.mrf.mxu1 }
  0xd8   : > { %v482_v16 = vadd.f32 %v481_v42, %v344_v41 }
  0xd9   : > { %v1082_v43 = vpop.f32.mrf.mxu0  ;;  %v1113_v44 = vpop.f32.mrf.mxu1 }
  0xdb   : > { %v349_v45 = vpop.f32.mrf.mxu0  ;;  %v486_v46 = vpop.f32.mrf.mxu1 }
  0xdc   : > { %v487_v24 = vadd.f32 %v486_v46, %v349_v45 }
  0xdd   : > { %v1085_v47 = vpop.f32.mrf.mxu0  ;;  %v1116_v48 = vpop.f32.mrf.mxu1 }
  0xdf   : > { %v354_v49 = vpop.f32.mrf.mxu0  ;;  %v491_v50 = vpop.f32.mrf.mxu1 }
  0xe0   : > { %v492_v33 = vadd.f32 %v491_v50, %v354_v49 }
  0xe1   : > { %v1088_v51 = vpop.f32.mrf.mxu0  ;;  %v1119_v52 = vpop.f32.mrf.mxu1 }
  0xe3   : > { %v359_v53 = vpop.f32.mrf.mxu0  ;;  %v496_v54 = vpop.f32.mrf.mxu1 }
  0xe4   : > { %v497_v42 = vadd.f32 %v496_v54, %v359_v53 }
  0xe5   : > { %v1091_v55 = vpop.f32.mrf.mxu0  ;;  %v1122_v56 = vpop.f32.mrf.mxu1 }
  0xe7   : > { %v1465_v57 = vpop.f32.mrf.mxu0  ;;  %v501_v58 = vpop.f32.mrf.mxu1 }
  0xe8   : > { %v502_v51 = vadd.f32 %v501_v58, %v1465_v57 }
  0xe9   : > { %v1094_v59 = vpop.f32.mrf.mxu0  ;;  %v1125_v60 = vpop.f32.mrf.mxu1 }
  0xeb   : > { %v1467_v61 = vpop.f32.mrf.mxu0  ;;  %v1469_v62 = vpop.f32.mrf.mxu1 }
  0xed   : > { %v1097_v63 = vpop.f32.mrf.mxu0  ;;  %v1128_v0 = vpop.f32.mrf.mxu1 }
  0xee   : > { %v507_v0 = vadd.f32 %v1469_v62, %v1467_v61 }
  0xef   : > { %v1471_v1 = vpop.f32.mrf.mxu0  ;;  %v1473_v2 = vpop.f32.mrf.mxu1 }
  0xf1   : > { %v1100_v3 = vpop.f32.mrf.mxu0  ;;  %v1131_v4 = vpop.f32.mrf.mxu1 }
  0xf3   : > { %v1475_v5 = vpop.f32.mrf.mxu0  ;;  %v1477_v6 = vpop.f32.mrf.mxu1 }
  0xf5   : > { %v1103_v7 = vpop.f32.mrf.mxu0  ;;  %v1134_v8 = vpop.f32.mrf.mxu1 }
  0xf7   : > { %v625_v10 = vpop.f32.mrf.mxu0  ;;  %v783_v11 = vpop.f32.mrf.mxu1 }
  0xf8   : > { %v669_v12 = vadd.f32 %v625_v10, %v477_v9 }
  0xf9   : > { %v1141_v14 = vpop.f32.mrf.mxu0  ;;  %v1172_v15 = vpop.f32.mrf.mxu1 }
  0xfa   : > { %v827_v17 = vadd.f32 %v783_v11, %v669_v12  ;;  %v512_v11 = vadd.f32 %v1473_v2, %v1471_v1 }
  0xfb   : > { %v630_v18 = vpop.f32.mrf.mxu0  ;;  %v788_v19 = vpop.f32.mrf.mxu1 }
  0xfc   : > { %v843_v20 = vadd.f32 %v1483_v13, %v827_v17  ;;  %v670_v21 = vadd.f32 %v630_v18, %v482_v16 }
  0xfd   : > { %v1144_v22 = vpop.f32.mrf.mxu0  ;;  %v1175_v23 = vpop.f32.mrf.mxu1 }
  0xfe   : > { %v852_v25 = vmax.f32 %v843_v20, 0.0  ;;  %v828_v26 = vadd.f32 %v788_v19, %v670_v21  ;;  %v517_v19 = vadd.f32 %v1477_v6, %v1475_v5 }
  0xff   : > { %v635_v27 = vpop.f32.mrf.mxu0  ;;  %v793_v28 = vpop.f32.mrf.mxu1 }
 0x100   : > { %861 = vst [vmem:[%s1489_s18] sm:$0xff] %v852_v25  ;;  %v844_v29 = vadd.f32 %v1483_v13, %v828_v26  ;;  %v671_v30 = vadd.f32 %v635_v27, %v487_v24 }
 0x101   : > { %v1147_v31 = vpop.f32.mrf.mxu0  ;;  %v1178_v32 = vpop.f32.mrf.mxu1 }
 0x102   : > { %v853_v34 = vmax.f32 %v844_v29, 0.0  ;;  %v829_v35 = vadd.f32 %v793_v28, %v671_v30 }
 0x103   : > { %v640_v36 = vpop.f32.mrf.mxu0  ;;  %v798_v37 = vpop.f32.mrf.mxu1 }
 0x104   : > { %862 = vst [vmem:[%s1489_s18 + $0x8] sm:$0xff] %v853_v34  ;;  %v845_v38 = vadd.f32 %v1483_v13, %v829_v35  ;;  %v672_v39 = vadd.f32 %v640_v36, %v492_v33 }
 0x105   : > { %v1150_v40 = vpop.f32.mrf.mxu0  ;;  %v1181_v41 = vpop.f32.mrf.mxu1 }
 0x106   : > { %v854_v43 = vmax.f32 %v845_v38, 0.0  ;;  %v830_v44 = vadd.f32 %v798_v37, %v672_v39 }
 0x107   : > { %v645_v45 = vpop.f32.mrf.mxu0  ;;  %v803_v46 = vpop.f32.mrf.mxu1 }
 0x108   : > { %863 = vst [vmem:[%s1489_s18 + $0x10] sm:$0xff] %v854_v43  ;;  %v846_v47 = vadd.f32 %v1483_v13, %v830_v44  ;;  %v673_v48 = vadd.f32 %v645_v45, %v497_v42 }
 0x109   : > { %v1153_v49 = vpop.f32.mrf.mxu0  ;;  %v1184_v50 = vpop.f32.mrf.mxu1 }
 0x10a   : > { %v855_v52 = vmax.f32 %v846_v47, 0.0  ;;  %v831_v55 = vadd.f32 %v803_v46, %v673_v48 }
 0x10b   : > { %v650_v56 = vpop.f32.mrf.mxu0  ;;  %v808_v59 = vpop.f32.mrf.mxu1 }
 0x10c   : > { %864 = vst [vmem:[%s1489_s18 + $0x18] sm:$0xff] %v855_v52  ;;  %v847_v53 = vadd.f32 %v1483_v13, %v831_v55  ;;  %v674_v54 = vadd.f32 %v650_v56, %v502_v51 }
 0x10d   : > { %v1156_v60 = vpop.f32.mrf.mxu0  ;;  %v1187_v63 = vpop.f32.mrf.mxu1 }
 0x10e   : > { %v856_v3 = vmax.f32 %v847_v53, 0.0  ;;  %v832_v4 = vadd.f32 %v808_v59, %v674_v54 }
 0x10f   : > { %v655_v7 = vpop.f32.mrf.mxu0  ;;  %v813_v8 = vpop.f32.mrf.mxu1 }
 0x110   : > { %865 = vst [vmem:[%s1489_s18 + $0x20] sm:$0xff] %v856_v3  ;;  %v848_v57 = vadd.f32 %v1483_v13, %v832_v4  ;;  %v675_v58 = vadd.f32 %v655_v7, %v507_v0 }
 0x111   : > { %v1159_v9 = vpop.f32.mrf.mxu0  ;;  %v1190_v10 = vpop.f32.mrf.mxu1 }
 0x112   : > { %v857_v12 = vmax.f32 %v848_v57, 0.0  ;;  %v833_v14 = vadd.f32 %v813_v8, %v675_v58 }
 0x113   : > { %v660_v15 = vpop.f32.mrf.mxu0  ;;  %v818_v16 = vpop.f32.mrf.mxu1 }
 0x114   : > { %866 = vst [vmem:[%s1489_s18 + $0x28] sm:$0xff] %v857_v12  ;;  %v849_v61 = vadd.f32 %v1483_v13, %v833_v14  ;;  %v676_v62 = vadd.f32 %v660_v15, %v512_v11 }
 0x115   : > { %v1162_v17 = vpop.f32.mrf.mxu0  ;;  %v1193_v18 = vpop.f32.mrf.mxu1 }
 0x116   : > { %v858_v20 = vmax.f32 %v849_v61, 0.0  ;;  %v834_v21 = vadd.f32 %v818_v16, %v676_v62 }
 0x117   : > { %v665_v22 = vpop.f32.mrf.mxu0  ;;  %v823_v23 = vpop.f32.mrf.mxu1 }
 0x118   : > { %867 = vst [vmem:[%s1489_s18 + $0x30] sm:$0xff] %v858_v20  ;;  %v850_v1 = vadd.f32 %v1483_v13, %v834_v21  ;;  %v677_v2 = vadd.f32 %v665_v22, %v517_v19 }
 0x119   : > { %v1165_v24 = vpop.f32.mrf.mxu0  ;;  %v1196_v25 = vpop.f32.mrf.mxu1 }
 0x11a   : > { %v859_v26 = vmax.f32 %v850_v1, 0.0  ;;  %v835_v27 = vadd.f32 %v823_v23, %v677_v2 }
 0x11c   : > { %868 = vst [vmem:[%s1489_s18 + $0x38] sm:$0xff] %v859_v26  ;;  %v851_v28 = vadd.f32 %v1483_v13, %v835_v27 }
 0x11e   : > { %v860_v29 = vmax.f32 %v851_v28, 0.0 }
 0x120   : > { %869 = vst [vmem:[%s1489_s18 + $0x40] sm:$0xff] %v860_v29 }
 0x121 PF: > { %s13_s14 = sadd.s32 1, %s1247_s14   ;;  %s1528_s12 = smov %s1243_s13 }
 0x122   : > { %p10_p5 = scmp.ge.s32.totalorder %s13_s14, 4   ;;  %s1529_s13 = smov %s1531_s15 }
 0x124   :  { %12 = sbr.rel (!%p10_p5) target bundleno = 2 (0x2), region = 71 }

// kernel: encoder_forward.4
= control target key start
LH: loop header
LB: loop body
LE: loop exit
PB: predicated region body
PF: predicated region fallthrough
CT: control target
= control target key end

     0   :  { %s2050_s12 = smov 0   ;;  %s2052_s13 = smov 0   ;;  %s3000_s0 = inlined_call_operand.vmem [shape: f32[2,26,512], index: 0, kind: input, shape index: {}]   ;;  %s3001_s1 = inlined_call_operand.vmem [shape: f32[4,512,128], index: 1, kind: input, shape index: {}]   ;;  %s3002_s2 = inlined_call_operand.vmem [shape: f32[1,128], index: 2, kind: input, shape index: {}]   ;;  %s3003_s3 = inlined_call_operand.vmem [shape: f32[2,20,128], index: 3, kind: output, shape index: {}]  }
   0x1   :  { %s2054_s14 = smov 0  }
   0x2 LB: > { %s25_s15 = sadd.s32 1, %s2024_s13  ;;  %p1449_p0 = scmp.ge.s32.totalorder %s2028_s14, 1  ;;  %s2028_s14 = sphi %s2054_s14, %s13_s14   ;;  %s2024_s13 = sphi %s2052_s13, %s3005_s13   ;;  %s2020_s12 = sphi %s2050_s12, %s3004_s12  }
   0x3   : > { %p27_p1 = scmp.ge.s32.totalorder %s25_s15, 2  ;;  %p168_p2 = scmp.lt.s32.totalorder %s2028_s14, 3 }
   0x5   : > { %s3007_s15 = smov (%p27_p1, %s25_s15), 0  ;;  %p169_p3 = pnand %p1449_p0, %p168_p2 }
   0x6   : > { %p202_p4 = scmp.lt.s32.totalorder (!%p169_p3), %s2020_s12, 1 }
   0x7   : > { %172 = sbr.rel (%p169_p3) target bundleno = 376 (0x178), region = 32 }
   0xc   : > { %v1484_v0 = vld [vmem:[%s3001_s1 + $0x2f8] sm:$0xff]  ;;  %v1483_v4 = vld [vmem:[%s3001_s1 + $0x2f0] sm:$0xff]  ;;  %v1482_v8 = vld [vmem:[%s3001_s1 + $0x2e8] sm:$0xff]  ;;  %s3009_s12 = smov (!%p202_p4, %s2020_s12), 1  ;;  %vm383_vm0 = vcmask 1046528   ;;  %vm833_vm1 = vcmask 1042432  }
   0xd   : > { %v1516_v1 = vld [vmem:[%s3001_s1 + $0x3f8] sm:$0xff]  ;;  %1649 = vmatprep.subr.mxu0 %v1484_v0  ;;  %v1515_v5 = vld [vmem:[%s3001_s1 + $0x3f0] sm:$0xff]  ;;  %v1514_v9 = vld [vmem:[%s3001_s1 + $0x3e8] sm:$0xff]  ;;  %s1648_s23 = sshll.u32 %s3009_s12, 7  ;;  %vm1118_vm2 = vcmask 1041408  }
   0xe   : > { %v1468_v2 = vld [vmem:[%s3001_s1 + $0x278] sm:$0xff]  ;;  %1690 = vmatprep.subr.mxu1 %v1516_v1  ;;  %v1467_v6 = vld [vmem:[%s3001_s1 + $0x270] sm:$0xff]  ;;  %v1466_v10 = vld [vmem:[%s3001_s1 + $0x268] sm:$0xff]  ;;  %s2218_s19 = scalar_lea.vmem %s3000_s0, %s1648_s23 }
   0xf   : > { %v1500_v3 = vld [vmem:[%s3001_s1 + $0x378] sm:$0xff]  ;;  %1650 = vmatpush3.msra.mxu0 %v1468_v2  ;;  %v1499_v7 = vld [vmem:[%s3001_s1 + $0x370] sm:$0xff]  ;;  %v1498_v11 = vld [vmem:[%s3001_s1 + $0x368] sm:$0xff] }
  0x10   : > { %1691 = vmatpush3.msra.mxu1 %v1500_v3  ;;  %1651 = vmatprep.subr.mxu0 %v1483_v4  ;;  %v1481_v12 = vld [vmem:[%s3001_s1 + $0x2e0] sm:$0xff]  ;;  %v1480_v16 = vld [vmem:[%s3001_s1 + $0x2d8] sm:$0xff]  ;;  %v1479_v20 = vld [vmem:[%s3001_s1 + $0x2d0] sm:$0xff] }
  0x11   : > { %1692 = vmatprep.subr.mxu1 %v1515_v5  ;;  %1652 = vmatpush3.msra.mxu0 %v1467_v6  ;;  %v1513_v13 = vld [vmem:[%s3001_s1 + $0x3e0] sm:$0xff]  ;;  %v1512_v17 = vld [vmem:[%s3001_s1 + $0x3d8] sm:$0xff]  ;;  %v1511_v21 = vld [vmem:[%s3001_s1 + $0x3d0] sm:$0xff] }
  0x12   : > { %1693 = vmatpush3.msra.mxu1 %v1499_v7  ;;  %1653 = vmatprep.subr.mxu0 %v1482_v8  ;;  %v1465_v14 = vld [vmem:[%s3001_s1 + $0x260] sm:$0xff]  ;;  %v1464_v18 = vld [vmem:[%s3001_s1 + $0x258] sm:$0xff]  ;;  %v1463_v22 = vld [vmem:[%s3001_s1 + $0x250] sm:$0xff] }
  0x13   : > { %1694 = vmatprep.subr.mxu1 %v1514_v9  ;;  %v1497_v15 = vld [vmem:[%s3001_s1 + $0x360] sm:$0xff]  ;;  %1654 = vmatpush3.msra.mxu0 %v1466_v10  ;;  %v1496_v19 = vld [vmem:[%s3001_s1 + $0x358] sm:$0xff]  ;;  %v1495_v23 = vld [vmem:[%s3001_s1 + $0x350] sm:$0xff] }
  0x14   : > { %1695 = vmatpush3.msra.mxu1 %v1498_v11  ;;  %1655 = vmatprep.subr.mxu0 %v1481_v12  ;;  %v1478_v24 = vld [vmem:[%s3001_s1 + $0x2c8] sm:$0xff]  ;;  %v1477_v28 = vld [vmem:[%s3001_s1 + $0x2c0] sm:$0xff]  ;;  %v1476_v32 = vld [vmem:[%s3001_s1 + $0x2b8] sm:$0xff] }
  0x15   : > { %1696 = vmatprep.subr.mxu1 %v1513_v13  ;;  %1656 = vmatpush3.msra.mxu0 %v1465_v14  ;;  %v1510_v25 = vld [vmem:[%s3001_s1 + $0x3c8] sm:$0xff]  ;;  %v1509_v29 = vld [vmem:[%s3001_s1 + $0x3c0] sm:$0xff]  ;;  %v1508_v33 = vld [vmem:[%s3001_s1 + $0x3b8] sm:$0xff] }
  0x16   : > { %1697 = vmatpush3.msra.mxu1 %v1497_v15  ;;  %1657 = vmatprep.subr.mxu0 %v1480_v16  ;;  %v1462_v26 = vld [vmem:[%s3001_s1 + $0x248] sm:$0xff]  ;;  %v1461_v30 = vld [vmem:[%s3001_s1 + $0x240] sm:$0xff]  ;;  %v1460_v34 = vld [vmem:[%s3001_s1 + $0x238] sm:$0xff] }
  0x17   : > { %1698 = vmatprep.subr.mxu1 %v1512_v17  ;;  %1658 = vmatpush3.msra.mxu0 %v1464_v18  ;;  %v1494_v27 = vld [vmem:[%s3001_s1 + $0x348] sm:$0xff]  ;;  %v1493_v31 = vld [vmem:[%s3001_s1 + $0x340] sm:$0xff]  ;;  %v1492_v35 = vld [vmem:[%s3001_s1 + $0x338] sm:$0xff] }
  0x18   : > { %1699 = vmatpush3.msra.mxu1 %v1496_v19  ;;  %1659 = vmatprep.subr.mxu0 %v1479_v20  ;;  %v1475_v36 = vld [vmem:[%s3001_s1 + $0x2b0] sm:$0xff]  ;;  %v1474_v40 = vld [vmem:[%s3001_s1 + $0x2a8] sm:$0xff]  ;;  %v1473_v44 = vld [vmem:[%s3001_s1 + $0x2a0] sm:$0xff] }
  0x19   : > { %1700 = vmatprep.subr.mxu1 %v1511_v21  ;;  %1660 = vmatpush3.msra.mxu0 %v1463_v22  ;;  %v1507_v37 = vld [vmem:[%s3001_s1 + $0x3b0] sm:$0xff]  ;;  %v1506_v41 = vld [vmem:[%s3001_s1 + $0x3a8] sm:$0xff]  ;;  %v1505_v45 = vld [vmem:[%s3001_s1 + $0x3a0] sm:$0xff] }
  0x1a   : > { %1701 = vmatpush3.msra.mxu1 %v1495_v23  ;;  %1661 = vmatprep.subr.mxu0 %v1478_v24  ;;  %v1459_v38 = vld [vmem:[%s3001_s1 + $0x230] sm:$0xff]  ;;  %v1458_v42 = vld [vmem:[%s3001_s1 + $0x228] sm:$0xff]  ;;  %v1457_v46 = vld [vmem:[%s3001_s1 + $0x220] sm:$0xff] }
  0x1b   : > { %1702 = vmatprep.subr.mxu1 %v1510_v25  ;;  %1662 = vmatpush3.msra.mxu0 %v1462_v26  ;;  %v1491_v39 = vld [vmem:[%s3001_s1 + $0x330] sm:$0xff]  ;;  %v1490_v43 = vld [vmem:[%s3001_s1 + $0x328] sm:$0xff]  ;;  %v1489_v47 = vld [vmem:[%s3001_s1 + $0x320] sm:$0xff] }
  0x1c   : > { %1703 = vmatpush3.msra.mxu1 %v1494_v27  ;;  %1663 = vmatprep.subr.mxu0 %v1477_v28  ;;  %v1472_v48 = vld [vmem:[%s3001_s1 + $0x298] sm:$0xff]  ;;  %v1471_v52 = vld [vmem:[%s3001_s1 + $0x290] sm:$0xff]  ;;  %v2245_v54 = vld [vmem:[%s2218_s19 + $0x28] sm:$0xff] }
  0x1d   : > { %1704 = vmatprep.subr.mxu1 %v1509_v29  ;;  %1664 = vmatpush3.msra.mxu0 %v1461_v30  ;;  %v1504_v49 = vld [vmem:[%s3001_s1 + $0x398] sm:$0xff]  ;;  %v1503_v53 = vld [vmem:[%s3001_s1 + $0x390] sm:$0xff]  ;;  %v299_v55 = vld [vmem:[%s2218_s19 + $0x8] sm:$0xfe]  ;;  %v388_v1 = vrot.slane %v2245_v54, 1 }
  0x1e   : > { %1705 = vmatpush3.msra.mxu1 %v1493_v31  ;;  %1665 = vmatprep.subr.mxu0 %v1476_v32  ;;  %v1456_v50 = vld [vmem:[%s3001_s1 + $0x218] sm:$0xff]  ;;  %v2253_v58 = vld [vmem:[%s2218_s19 + $0x20] sm:$0xff]  ;;  %v2257_v60 = vld [vmem:[%s2218_s19 + $0x30] sm:$0xff]  ;;  %v387_v0 = vrot.slane %v299_v55, 1 }
  0x1f   : > { %1706 = vmatprep.subr.mxu1 %v1508_v33  ;;  %1666 = vmatpush3.msra.mxu0 %v1460_v34  ;;  %v1488_v51 = vld [vmem:[%s3001_s1 + $0x318] sm:$0xff]  ;;  %v298_v59 = vld [vmem:[%s2218_s19] sm:$0xfe]  ;;  %v300_v61 = vld [vmem:[%s2218_s19 + $0x10] sm:$0xfe]  ;;  %v385_v9 = vrot.slane %v2253_v58, 1 }
  0x20   : > { %1707 = vmatpush3.msra.mxu1 %v1492_v35  ;;  %1667 = vmatprep.subr.mxu0 %v1475_v36  ;;  %v2249_v56 = vld [vmem:[%s2218_s19 + $0x38] sm:$0xff]  ;;  %v1455_v62 = vld [vmem:[%s3001_s1 + $0x210] sm:$0xff]  ;;  %v1470_v2 = vld [vmem:[%s3001_s1 + $0x288] sm:$0xff]  ;;  %v384_v8 = vrot.slane %v298_v59, 1  ;;  %v390_v10 = vrot.slane %v300_v61, 1  ;;  %v391_v11 = vrot.slane %v2257_v60, 1  ;;  %v389_v15 = vsel %vm383_vm0, %v387_v0, %v388_v1 }
  0x21   : > { %1708 = vmatprep.subr.mxu1 %v1507_v37  ;;  %1668 = vmatpush3.msra.mxu0 %v1459_v38  ;;  %v301_v57 = vld [vmem:[%s2218_s19 + $0x18] sm:$0xfe]  ;;  %v1487_v63 = vld [vmem:[%s3001_s1 + $0x310] sm:$0xff]  ;;  %v1502_v3 = vld [vmem:[%s3001_s1 + $0x388] sm:$0xff]  ;;  %v394_v5 = vrot.slane %v2249_v56, 1 }
  0x22   : > { %1709 = vmatpush3.msra.mxu1 %v1491_v39  ;;  %1669 = vmatprep.subr.mxu0 %v1474_v40  ;;  %v393_v4 = vrot.slane %v301_v57, 1  ;;  %v1454_v6 = vld [vmem:[%s3001_s1 + $0x208] sm:$0xff]  ;;  %v1469_v12 = vld [vmem:[%s3001_s1 + $0x280] sm:$0xff]  ;;  %v386_v18 = vsel %vm383_vm0, %v384_v8, %v385_v9  ;;  %v392_v19 = vsel %vm383_vm0, %v390_v10, %v391_v11  ;;  %v265_v20 = vld [vmem:[%s3001_s1 + $0xf8] sm:$0xff] }
  0x23   : > { %1710 = vmatprep.subr.mxu1 %v1506_v41  ;;  %1670 = vmatpush3.msra.mxu0 %v1458_v42  ;;  %v1486_v7 = vld [vmem:[%s3001_s1 + $0x308] sm:$0xff]  ;;  %v1501_v13 = vld [vmem:[%s3001_s1 + $0x380] sm:$0xff]  ;;  %v297_v21 = vld [vmem:[%s3001_s1 + $0x1f8] sm:$0xff] }
  0x24   : > { %1711 = vmatpush3.msra.mxu1 %v1490_v43  ;;  %1671 = vmatprep.subr.mxu0 %v1473_v44  ;;  %v1453_v14 = vld [vmem:[%s3001_s1 + $0x200] sm:$0xff]  ;;  %v395_v17 = vsel %vm383_vm0, %v393_v4, %v394_v5  ;;  %v249_v22 = vld [vmem:[%s3001_s1 + $0x78] sm:$0xff]  ;;  %v264_v24 = vld [vmem:[%s3001_s1 + $0xf0] sm:$0xff] }
  0x25   : > { %1712 = vmatprep.subr.mxu1 %v1505_v45  ;;  %1672 = vmatpush3.msra.mxu0 %v1457_v46  ;;  %v1485_v16 = vld [vmem:[%s3001_s1 + $0x300] sm:$0xff]  ;;  %v281_v23 = vld [vmem:[%s3001_s1 + $0x178] sm:$0xff]  ;;  %v296_v25 = vld [vmem:[%s3001_s1 + $0x1f0] sm:$0xff] }
  0x26   : > { %1713 = vmatpush3.msra.mxu1 %v1489_v47  ;;  %1673 = vmatprep.subr.mxu0 %v1472_v48  ;;  %v248_v26 = vld [vmem:[%s3001_s1 + $0x70] sm:$0xff]  ;;  %v263_v28 = vld [vmem:[%s3001_s1 + $0xe8] sm:$0xff]  ;;  %v262_v32 = vld [vmem:[%s3001_s1 + $0xe0] sm:$0xff] }
  0x27   : > { %1714 = vmatprep.subr.mxu1 %v1504_v49  ;;  %1674 = vmatpush3.msra.mxu0 %v1456_v50  ;;  %v280_v27 = vld [vmem:[%s3001_s1 + $0x170] sm:$0xff]  ;;  %v295_v29 = vld [vmem:[%s3001_s1 + $0x1e8] sm:$0xff]  ;;  %v294_v33 = vld [vmem:[%s3001_s1 + $0x1e0] sm:$0xff] }
  0x28   : > { %1715 = vmatpush3.msra.mxu1 %v1488_v51  ;;  %1675 = vmatprep.subr.mxu0 %v1471_v52  ;;  %v247_v30 = vld [vmem:[%s3001_s1 + $0x68] sm:$0xff]  ;;  %v246_v34 = vld [vmem:[%s3001_s1 + $0x60] sm:$0xff]  ;;  %v261_v36 = vld [vmem:[%s3001_s1 + $0xd8] sm:$0xff] }
  0x29   : > { %1716 = vmatprep.subr.mxu1 %v1503_v53  ;;  %1676 = vmatpush3.msra.mxu0 %v1455_v62  ;;  %v279_v31 = vld [vmem:[%s3001_s1 + $0x168] sm:$0xff]  ;;  %v278_v35 = vld [vmem:[%s3001_s1 + $0x160] sm:$0xff]  ;;  %v293_v37 = vld [vmem:[%s3001_s1 + $0x1d8] sm:$0xff] }
  0x2a   : > { %1717 = vmatpush3.msra.mxu1 %v1487_v63  ;;  %1677 = vmatprep.subr.mxu0 %v1470_v2  ;;  %v245_v38 = vld [vmem:[%s3001_s1 + $0x58] sm:$0xff]  ;;  %v260_v40 = vld [vmem:[%s3001_s1 + $0xd0] sm:$0xff]  ;;  %v259_v44 = vld [vmem:[%s3001_s1 + $0xc8] sm:$0xff] }
  0x2b   : > { %1718 = vmatprep.subr.mxu1 %v1502_v3  ;;  %1678 = vmatpush3.msra.mxu0 %v1454_v6  ;;  %v277_v39 = vld [vmem:[%s3001_s1 + $0x158] sm:$0xff]  ;;  %v292_v41 = vld [vmem:[%s3001_s1 + $0x1d0] sm:$0xff]  ;;  %v291_v45 = vld [vmem:[%s3001_s1 + $0x1c8] sm:$0xff] }
  0x2c   : > { %1719 = vmatpush3.msra.mxu1 %v1486_v7  ;;  %1679 = vmatprep.subr.mxu0 %v1469_v12  ;;  %v244_v42 = vld [vmem:[%s3001_s1 + $0x50] sm:$0xff]  ;;  %v243_v46 = vld [vmem:[%s3001_s1 + $0x48] sm:$0xff]  ;;  %v258_v48 = vld [vmem:[%s3001_s1 + $0xc0] sm:$0xff] }
  0x2d   : > { %1720 = vmatprep.subr.mxu1 %v1501_v13  ;;  %1680 = vmatpush3.msra.mxu0 %v1453_v14  ;;  %v276_v43 = vld [vmem:[%s3001_s1 + $0x150] sm:$0xff]  ;;  %v275_v47 = vld [vmem:[%s3001_s1 + $0x148] sm:$0xff]  ;;  %v290_v49 = vld [vmem:[%s3001_s1 + $0x1c0] sm:$0xff] }
  0x2e   : > { %480 = vmatprep.mubr.f32.mxu0 %v389_v15  ;;  %1721 = vmatpush3.msra.mxu1 %v1485_v16  ;;  %v242_v50 = vld [vmem:[%s3001_s1 + $0x40] sm:$0xff]  ;;  %v2403_v52 = vld [vmem:[%s2218_s19 + $0x48] sm:$0x1f]  ;;  %v2406_v53 = vld [vmem:[%s2218_s19 + $0x58] sm:$0x1f] }
  0x2f   : > { %560 = vmatprep.mubr.f32.mxu1 %v395_v17  ;;  %481 = vmatmul.mubr.f32.vlgmr.msra.gmra.mxu0 %v386_v18  ;;  %v274_v51 = vld [vmem:[%s3001_s1 + $0x140] sm:$0xff]  ;;  %v257_v55 = vld [vmem:[%s3001_s1 + $0xb8] sm:$0xff]  ;;  %v304_v63 = vld [vmem:[%s2218_s19 + $0x50] sm:$0x1f]  ;;  %v398_v3 = vrot.slane %v2403_v52, 1  ;;  %v402_v4 = vrot.slane %v2406_v53, 1 }
  0x30   : > { %561 = vmatmul.mubr.f32.vlgmr.msra.gmra.mxu1 %v392_v19  ;;  %1731 = vmatprep.subr.mxu0 %v265_v20  ;;  %v289_v57 = vld [vmem:[%s3001_s1 + $0x1b8] sm:$0xff]  ;;  %v302_v62 = vld [vmem:[%s2218_s19 + $0x40] sm:$0x1f]  ;;  %v256_v0 = vld [vmem:[%s3001_s1 + $0xb0] sm:$0xff]  ;;  %v400_v13 = vrot.slane %v304_v63, 1 }
  0x31   : > { %1772 = vmatprep.subr.mxu1 %v297_v21  ;;  %1732 = vmatpush3.msra.mxu0 %v249_v22  ;;  %v241_v59 = vld [vmem:[%s3001_s1 + $0x38] sm:$0xff]  ;;  %v288_v2 = vld [vmem:[%s3001_s1 + $0x1b0] sm:$0xff]  ;;  %v255_v8 = vld [vmem:[%s3001_s1 + $0xa8] sm:$0xff]  ;;  %v396_v12 = vrot.slane %v302_v62, 1  ;;  %v399_v16 = vsel %vm383_vm0, %v388_v1, %v398_v3  ;;  %v403_v17 = vsel %vm383_vm0, %v394_v5, %v402_v4 }
  0x32   : > { %1773 = vmatpush3.msra.mxu1 %v281_v23  ;;  %1733 = vmatprep.subr.mxu0 %v264_v24  ;;  %v273_v61 = vld [vmem:[%s3001_s1 + $0x138] sm:$0xff]  ;;  %v240_v6 = vld [vmem:[%s3001_s1 + $0x30] sm:$0xff]  ;;  %v287_v10 = vld [vmem:[%s3001_s1 + $0x1a8] sm:$0xff]  ;;  %v401_v5 = vsel %vm383_vm0, %v391_v11, %v400_v13 }
  0x33   : > { %1774 = vmatprep.subr.mxu1 %v296_v25  ;;  %1734 = vmatpush3.msra.mxu0 %v248_v26  ;;  %v272_v7 = vld [vmem:[%s3001_s1 + $0x130] sm:$0xff]  ;;  %v239_v14 = vld [vmem:[%s3001_s1 + $0x28] sm:$0xff]  ;;  %v254_v18 = vld [vmem:[%s3001_s1 + $0xa0] sm:$0xff]  ;;  %v397_v1 = vsel %vm383_vm0, %v385_v9, %v396_v12 }
  0x34   : > { %1775 = vmatpush3.msra.mxu1 %v280_v27  ;;  %1735 = vmatprep.subr.mxu0 %v263_v28  ;;  %v271_v15 = vld [vmem:[%s3001_s1 + $0x128] sm:$0xff]  ;;  %v286_v19 = vld [vmem:[%s3001_s1 + $0x1a0] sm:$0xff]  ;;  %v253_v9 = vld [vmem:[%s3001_s1 + $0x98] sm:$0xff] }
  0x35   : > { %1776 = vmatprep.subr.mxu1 %v295_v29  ;;  %1736 = vmatpush3.msra.mxu0 %v247_v30  ;;  %v238_v20 = vld [vmem:[%s3001_s1 + $0x20] sm:$0xff]  ;;  %v285_v11 = vld [vmem:[%s3001_s1 + $0x198] sm:$0xff]  ;;  %v252_v24 = vld [vmem:[%s3001_s1 + $0x90] sm:$0xff] }
  0x36   : > { %1777 = vmatpush3.msra.mxu1 %v279_v31  ;;  %1737 = vmatprep.subr.mxu0 %v262_v32  ;;  %v270_v21 = vld [vmem:[%s3001_s1 + $0x120] sm:$0xff]  ;;  %v237_v22 = vld [vmem:[%s3001_s1 + $0x18] sm:$0xff]  ;;  %v284_v25 = vld [vmem:[%s3001_s1 + $0x190] sm:$0xff] }
  0x37   : > { %1778 = vmatprep.subr.mxu1 %v294_v33  ;;  %1738 = vmatpush3.msra.mxu0 %v246_v34  ;;  %v269_v23 = vld [vmem:[%s3001_s1 + $0x118] sm:$0xff]  ;;  %v236_v26 = vld [vmem:[%s3001_s1 + $0x10] sm:$0xff]  ;;  %v251_v28 = vld [vmem:[%s3001_s1 + $0x88] sm:$0xff] }
  0x38   : > { %1779 = vmatpush3.msra.mxu1 %v278_v35  ;;  %1739 = vmatprep.subr.mxu0 %v261_v36  ;;  %v268_v27 = vld [vmem:[%s3001_s1 + $0x110] sm:$0xff]  ;;  %v283_v29 = vld [vmem:[%s3001_s1 + $0x188] sm:$0xff]  ;;  %v250_v32 = vld [vmem:[%s3001_s1 + $0x80] sm:$0xff] }
  0x39   : > { %1780 = vmatprep.subr.mxu1 %v293_v37  ;;  %1740 = vmatpush3.msra.mxu0 %v245_v38  ;;  %v235_v30 = vld [vmem:[%s3001_s1 + $0x8] sm:$0xff]  ;;  %v282_v33 = vld [vmem:[%s3001_s1 + $0x180] sm:$0xff]  ;;  %v225_v37 = vld [vmem:[%s2218_s19 + $0x18] sm:$0xff] }
  0x3a   : > { %1781 = vmatpush3.msra.mxu1 %v277_v39  ;;  %1741 = vmatprep.subr.mxu0 %v260_v40  ;;  %v267_v31 = vld [vmem:[%s3001_s1 + $0x108] sm:$0xff]  ;;  %v234_v34 = vld [vmem:[%s3001_s1] sm:$0xff]  ;;  %v224_v39 = vld [vmem:[%s2218_s19 + $0x10] sm:$0xff] }
  0x3b   : > { %1782 = vmatprep.subr.mxu1 %v292_v41  ;;  %1742 = vmatpush3.msra.mxu0 %v244_v42  ;;  %v223_v35 = vld [vmem:[%s2218_s19 + $0x8] sm:$0xff]  ;;  %v266_v36 = vld [vmem:[%s3001_s1 + $0x100] sm:$0xff]  ;;  %v1548_v40 = vld [vmem:[%s3001_s1 + $0x4f8] sm:$0xff] }
  0x3c   : > { %1783 = vmatpush3.msra.mxu1 %v276_v43  ;;  %1743 = vmatprep.subr.mxu0 %v259_v44  ;;  %v222_v38 = vld [vmem:[%s2218_s19] sm:$0xff]  ;;  %v1580_v41 = vld [vmem:[%s3001_s1 + $0x5f8] sm:$0xff]  ;;  %v1547_v44 = vld [vmem:[%s3001_s1 + $0x4f0] sm:$0xff] }
  0x3d   : > { %1784 = vmatprep.subr.mxu1 %v291_v45  ;;  %1744 = vmatpush3.msra.mxu0 %v243_v46  ;;  %v1532_v42 = vld [vmem:[%s3001_s1 + $0x478] sm:$0xff]  ;;  %v1579_v45 = vld [vmem:[%s3001_s1 + $0x5f0] sm:$0xff]  ;;  %v1545_v52 = vld [vmem:[%s3001_s1 + $0x4e0] sm:$0xff] }
  0x3e   : > { %1785 = vmatpush3.msra.mxu1 %v275_v47  ;;  %1745 = vmatprep.subr.mxu0 %v258_v48  ;;  %v1564_v43 = vld [vmem:[%s3001_s1 + $0x578] sm:$0xff]  ;;  %v1531_v46 = vld [vmem:[%s3001_s1 + $0x470] sm:$0xff]  ;;  %v1546_v48 = vld [vmem:[%s3001_s1 + $0x4e8] sm:$0xff] }
  0x3f   : > { %1786 = vmatprep.subr.mxu1 %v290_v49  ;;  %1746 = vmatpush3.msra.mxu0 %v242_v50  ;;  %v1563_v47 = vld [vmem:[%s3001_s1 + $0x570] sm:$0xff]  ;;  %v1578_v49 = vld [vmem:[%s3001_s1 + $0x5e8] sm:$0xff]  ;;  %v1577_v53 = vld [vmem:[%s3001_s1 + $0x5e0] sm:$0xff] }
  0x40   : > { %1787 = vmatpush3.msra.mxu1 %v274_v51  ;;  %1747 = vmatprep.subr.mxu0 %v257_v55  ;;  %v1530_v50 = vld [vmem:[%s3001_s1 + $0x468] sm:$0xff]  ;;  %v1544_v62 = vld [vmem:[%s3001_s1 + $0x4d8] sm:$0xff] }
  0x41   : > { %1788 = vmatprep.subr.mxu1 %v289_v57  ;;  %1748 = vmatpush3.msra.mxu0 %v241_v59  ;;  %v1562_v51 = vld [vmem:[%s3001_s1 + $0x568] sm:$0xff]  ;;  %v1529_v57 = vld [vmem:[%s3001_s1 + $0x460] sm:$0xff]  ;;  %v1576_v63 = vld [vmem:[%s3001_s1 + $0x5d8] sm:$0xff] }
  0x42   : > { %1789 = vmatpush3.msra.mxu1 %v273_v61  ;;  %1749 = vmatprep.subr.mxu0 %v256_v0  ;;  %v231_v55 = vld [vmem:[%s2218_s19 + $0x48] sm:$0xf]  ;;  %v1561_v59 = vld [vmem:[%s3001_s1 + $0x560] sm:$0xff]  ;;  %v233_v0 = vld [vmem:[%s2218_s19 + $0x58] sm:$0xf] }
  0x43   : > { %1790 = vmatprep.subr.mxu1 %v288_v2  ;;  %1750 = vmatpush3.msra.mxu0 %v240_v6  ;;  %v230_v61 = vld [vmem:[%s2218_s19 + $0x40] sm:$0xf]  ;;  %v1528_v2 = vld [vmem:[%s3001_s1 + $0x458] sm:$0xff]  ;;  %v232_v6 = vld [vmem:[%s2218_s19 + $0x50] sm:$0xf] }
  0x44   : > { %1791 = vmatpush3.msra.mxu1 %v272_v7  ;;  %1751 = vmatprep.subr.mxu0 %v255_v8  ;;  %v1575_v7 = vld [vmem:[%s3001_s1 + $0x5d0] sm:$0xff] }
  0x45   : > { %1792 = vmatprep.subr.mxu1 %v287_v10  ;;  %1752 = vmatpush3.msra.mxu0 %v239_v14  ;;  %v1527_v8 = vld [vmem:[%s3001_s1 + $0x450] sm:$0xff]  ;;  %v1526_v14 = vld [vmem:[%s3001_s1 + $0x448] sm:$0xff] }
  0x46   : > { %1793 = vmatpush3.msra.mxu1 %v271_v15  ;;  %485 = vmatprep.mubr.f32.mxu0 %v399_v16  ;;  %v1559_v10 = vld [vmem:[%s3001_s1 + $0x550] sm:$0xff]  ;;  %v1558_v15 = vld [vmem:[%s3001_s1 + $0x548] sm:$0xff]  ;;  %v1541_v16 = vld [vmem:[%s3001_s1 + $0x4c0] sm:$0xff] }
  0x47   : > { %565 = vmatprep.mubr.f32.mxu1 %v403_v17  ;;  %1753 = vmatprep.subr.mxu0 %v254_v18  ;;  %v1573_v17 = vld [vmem:[%s3001_s1 + $0x5c0] sm:$0xff] }
  0x48   : > { %1794 = vmatprep.subr.mxu1 %v286_v19  ;;  %486 = vmatmul.mubr.f32.gmra.mxu0 %v397_v1  ;;  %v1525_v18 = vld [vmem:[%s3001_s1 + $0x440] sm:$0xff]  ;;  %v1540_v1 = vld [vmem:[%s3001_s1 + $0x4b8] sm:$0xff] }
  0x49   : > { %566 = vmatmul.mubr.f32.gmra.mxu1 %v401_v5  ;;  %1754 = vmatpush3.msra.mxu0 %v238_v20  ;;  %v1557_v19 = vld [vmem:[%s3001_s1 + $0x540] sm:$0xff]  ;;  %v1572_v5 = vld [vmem:[%s3001_s1 + $0x5b8] sm:$0xff] }
  0x4a   : > { %1795 = vmatpush3.msra.mxu1 %v270_v21  ;;  %1755 = vmatprep.subr.mxu0 %v253_v9  ;;  %v1524_v20 = vld [vmem:[%s3001_s1 + $0x438] sm:$0xff]  ;;  %v1539_v9 = vld [vmem:[%s3001_s1 + $0x4b0] sm:$0xff] }
  0x4b   : > { %1796 = vmatprep.subr.mxu1 %v285_v11  ;;  %1756 = vmatpush3.msra.mxu0 %v237_v22  ;;  %v1556_v21 = vld [vmem:[%s3001_s1 + $0x538] sm:$0xff]  ;;  %v1571_v11 = vld [vmem:[%s3001_s1 + $0x5b0] sm:$0xff] }
  0x4c   : > { %1797 = vmatpush3.msra.mxu1 %v269_v23  ;;  %490 = vmatprep.mubr.f32.mxu0 %v398_v3  ;;  %v1560_v3 = vld [vmem:[%s3001_s1 + $0x558] sm:$0xff]  ;;  %v1523_v22 = vld [vmem:[%s3001_s1 + $0x430] sm:$0xff] }
  0x4d   : > { %570 = vmatprep.mubr.f32.mxu1 %v402_v4  ;;  %1757 = vmatprep.subr.mxu0 %v252_v24  ;;  %v1543_v4 = vld [vmem:[%s3001_s1 + $0x4d0] sm:$0xff]  ;;  %v1538_v24 = vld [vmem:[%s3001_s1 + $0x4a8] sm:$0xff] }
  0x4e   : > { %1798 = vmatprep.subr.mxu1 %v284_v25  ;;  %491 = vmatmul.mubr.f32.gmra.mxu0 %v396_v12  ;;  %v1542_v12 = vld [vmem:[%s3001_s1 + $0x4c8] sm:$0xff]  ;;  %v1555_v23 = vld [vmem:[%s3001_s1 + $0x530] sm:$0xff] }
  0x4f   : > { %571 = vmatmul.mubr.f32.gmra.mxu1 %v400_v13  ;;  %1758 = vmatpush3.msra.mxu0 %v236_v26  ;;  %v1574_v13 = vld [vmem:[%s3001_s1 + $0x5c8] sm:$0xff] }
  0x50   : > { %1799 = vmatpush3.msra.mxu1 %v268_v27  ;;  %1759 = vmatprep.subr.mxu0 %v251_v28  ;;  %v1570_v25 = vld [vmem:[%s3001_s1 + $0x5a8] sm:$0xff]  ;;  %v1537_v28 = vld [vmem:[%s3001_s1 + $0x4a0] sm:$0xff] }
  0x51   : > { %1800 = vmatprep.subr.mxu1 %v283_v29  ;;  %1760 = vmatpush3.msra.mxu0 %v235_v30  ;;  %v1522_v26 = vld [vmem:[%s3001_s1 + $0x428] sm:$0xff]  ;;  %v1569_v29 = vld [vmem:[%s3001_s1 + $0x5a0] sm:$0xff] }
  0x52   : > { %1801 = vmatpush3.msra.mxu1 %v267_v31  ;;  %1761 = vmatprep.subr.mxu0 %v250_v32  ;;  %v1554_v27 = vld [vmem:[%s3001_s1 + $0x528] sm:$0xff]  ;;  %v1521_v30 = vld [vmem:[%s3001_s1 + $0x420] sm:$0xff]  ;;  %v1536_v32 = vld [vmem:[%s3001_s1 + $0x498] sm:$0xff] }
  0x53   : > { %1802 = vmatprep.subr.mxu1 %v282_v33  ;;  %1762 = vmatpush3.msra.mxu0 %v234_v34  ;;  %v1553_v31 = vld [vmem:[%s3001_s1 + $0x520] sm:$0xff]  ;;  %v1568_v33 = vld [vmem:[%s3001_s1 + $0x598] sm:$0xff] }
  0x54   : > { %640 = vmatprep.mubr.f32.mxu0 %v223_v35  ;;  %1803 = vmatpush3.msra.mxu1 %v266_v36  ;;  %v1520_v34 = vld [vmem:[%s3001_s1 + $0x418] sm:$0xff]  ;;  %v737_v35 = vld [vmem:[%s2218_s19 + $0x8] sm:$0xe0] }
  0x55   : > { %720 = vmatprep.mubr.f32.mxu1 %v225_v37  ;;  %641 = vmatmul.mubr.f32.vlgmr.msra.gmra.mxu0 %v222_v38  ;;  %v1552_v36 = vld [vmem:[%s3001_s1 + $0x518] sm:$0xff]  ;;  %v1535_v37 = vld [vmem:[%s3001_s1 + $0x490] sm:$0xff] }
  0x56   : > { %721 = vmatmul.mubr.f32.vlgmr.msra.gmra.mxu1 %v224_v39  ;;  %1813 = vmatprep.subr.mxu0 %v1548_v40  ;;  %v739_v38 = vld [vmem:[%s2218_s19 + $0x18] sm:$0xe0]  ;;  %v1567_v39 = vld [vmem:[%s3001_s1 + $0x590] sm:$0xff]  ;;  %v736_v40 = vld [vmem:[%s2218_s19] sm:$0xe0] }
  0x57   : > { %1854 = vmatprep.subr.mxu1 %v1580_v41  ;;  %1814 = vmatpush3.msra.mxu0 %v1532_v42  ;;  %v738_v41 = vld [vmem:[%s2218_s19 + $0x10] sm:$0xe0] }
  0x58   : > { %1855 = vmatpush3.msra.mxu1 %v1564_v43  ;;  %1815 = vmatprep.subr.mxu0 %v1547_v44  ;;  %v1519_v42 = vld [vmem:[%s3001_s1 + $0x410] sm:$0xff]  ;;  %v837_v44 = vrot.slane %v737_v35, 5 }
  0x59   : > { %1856 = vmatprep.subr.mxu1 %v1579_v45  ;;  %645 = vmatprep.mubr.f32.mxu0 %v2245_v54  ;;  %v1551_v43 = vld [vmem:[%s3001_s1 + $0x510] sm:$0xff]  ;;  %v838_v45 = vrot.slane %v2245_v54, 5  ;;  %v1518_v54 = vld [vmem:[%s3001_s1 + $0x408] sm:$0xff] }
  0x5a   : > { %1816 = vmatpush3.msra.mxu0 %v1531_v46  ;;  %1857 = vmatpush3.msra.mxu1 %v1563_v47  ;;  %v1534_v46 = vld [vmem:[%s3001_s1 + $0x488] sm:$0xff] }
  0x5b   : > { %646 = vmatmul.mubr.f32.gmra.mxu0 %v2253_v58  ;;  %1817 = vmatprep.subr.mxu0 %v1546_v48  ;;  %v1566_v47 = vld [vmem:[%s3001_s1 + $0x588] sm:$0xff]  ;;  %v843_v48 = vrot.slane %v739_v38, 5 }
  0x5c   : > { %1858 = vmatprep.subr.mxu1 %v1578_v49  ;;  %725 = vmatprep.mubr.f32.mxu1 %v2249_v56  ;;  %v844_v49 = vrot.slane %v2249_v56, 5  ;;  %v841_v56 = vrot.slane %v2257_v60, 5 }
  0x5d   : > { %1818 = vmatpush3.msra.mxu0 %v1530_v50  ;;  %1859 = vmatpush3.msra.mxu1 %v1562_v51  ;;  %v835_v50 = vrot.slane %v2253_v58, 5  ;;  %v1550_v51 = vld [vmem:[%s3001_s1 + $0x508] sm:$0xff]  ;;  %v1565_v58 = vld [vmem:[%s3001_s1 + $0x580] sm:$0xff] }
  0x5e   : > { %1819 = vmatprep.subr.mxu0 %v1545_v52  ;;  %726 = vmatmul.mubr.f32.gmra.mxu1 %v2257_v60  ;;  %v1533_v52 = vld [vmem:[%s3001_s1 + $0x480] sm:$0xff] }
  0x5f   : > { %1860 = vmatprep.subr.mxu1 %v1577_v53  ;;  %650 = vmatprep.mubr.f32.mxu0 %v231_v55  ;;  %v834_v53 = vrot.slane %v736_v40, 5  ;;  %v840_v55 = vrot.slane %v738_v41, 5  ;;  %v1549_v60 = vld [vmem:[%s3001_s1 + $0x500] sm:$0xff]  ;;  %v1608_v40 = vld [vmem:[%s3001_s1 + $0x6d8] sm:$0xff] }
  0x60   : > { %1820 = vmatpush3.msra.mxu0 %v1529_v57  ;;  %1861 = vmatpush3.msra.mxu1 %v1561_v59  ;;  %v2727_v57 = vld [vmem:[%s2218_s19 + $0x48] sm:$0xff]  ;;  %v2730_v59 = vld [vmem:[%s2218_s19 + $0x58] sm:$0xff] }
  0x61   : > { %651 = vmatmul.mubr.f32.gmra.mxu0 %v230_v61  ;;  %1821 = vmatprep.subr.mxu0 %v1544_v62  ;;  %v1517_v61 = vld [vmem:[%s3001_s1 + $0x400] sm:$0xff]  ;;  %v839_v62 = vsel %vm833_vm1, %v837_v44, %v838_v45  ;;  %v1640_v41 = vld [vmem:[%s3001_s1 + $0x7d8] sm:$0xff]  ;;  %v1607_v44 = vld [vmem:[%s3001_s1 + $0x6d0] sm:$0xff] }
  0x62   : > { %1862 = vmatprep.subr.mxu1 %v1576_v63  ;;  %730 = vmatprep.mubr.f32.mxu1 %v233_v0  ;;  %v845_v63 = vsel %vm833_vm1, %v843_v48, %v844_v49  ;;  %v2741_v0 = vld [vmem:[%s2218_s19 + $0x40] sm:$0xff]  ;;  %v1606_v48 = vld [vmem:[%s3001_s1 + $0x6c8] sm:$0xff] }
  0x63   : > { %1822 = vmatpush3.msra.mxu0 %v1528_v2  ;;  %1863 = vmatpush3.msra.mxu1 %v1560_v3  ;;  %v2744_v2 = vld [vmem:[%s2218_s19 + $0x50] sm:$0xff]  ;;  %v836_v3 = vsel %vm833_vm1, %v834_v53, %v835_v50  ;;  %v1589_v53 = vld [vmem:[%s3001_s1 + $0x640] sm:$0xff] }
  0x64   : > { %1823 = vmatprep.subr.mxu0 %v1543_v4  ;;  %731 = vmatmul.mubr.f32.gmra.mxu1 %v232_v6  ;;  %v842_v4 = vsel %vm833_vm1, %v840_v55, %v841_v56  ;;  %v848_v6 = vrot.slane %v2727_v57, 5  ;;  %v1621_v55 = vld [vmem:[%s3001_s1 + $0x740] sm:$0xff] }
  0x65   : > { %1864 = vmatprep.subr.mxu1 %v1575_v7  ;;  %1824 = vmatpush3.msra.mxu0 %v1527_v8  ;;  %v852_v7 = vrot.slane %v2730_v59, 5  ;;  %v1612_v8 = vld [vmem:[%s3001_s1 + $0x6f8] sm:$0xff] }
  0x66   : > { %1865 = vmatpush3.msra.mxu1 %v1559_v10  ;;  %1825 = vmatprep.subr.mxu0 %v1542_v12  ;;  %v1644_v10 = vld [vmem:[%s3001_s1 + $0x7f8] sm:$0xff] }
  0x67   : > { %1866 = vmatprep.subr.mxu1 %v1574_v13  ;;  %1826 = vmatpush3.msra.mxu0 %v1526_v14  ;;  %v1596_v12 = vld [vmem:[%s3001_s1 + $0x678] sm:$0xff]  ;;  %v1611_v14 = vld [vmem:[%s3001_s1 + $0x6f0] sm:$0xff] }
  0x68   : > { %1867 = vmatpush3.msra.mxu1 %v1558_v15  ;;  %1827 = vmatprep.subr.mxu0 %v1541_v16  ;;  %v1628_v13 = vld [vmem:[%s3001_s1 + $0x778] sm:$0xff]  ;;  %v846_v15 = vrot.slane %v2741_v0, 5  ;;  %v850_v16 = vrot.slane %v2744_v2, 5 }
  0x69   : > { %1868 = vmatprep.subr.mxu1 %v1573_v17  ;;  %1828 = vmatpush3.msra.mxu0 %v1525_v18  ;;  %v1643_v17 = vld [vmem:[%s3001_s1 + $0x7f0] sm:$0xff]  ;;  %v749_v18 = vld [vmem:[%s2218_s19 + $0x68] sm:$0x1] }
  0x6a   : > { %1869 = vmatpush3.msra.mxu1 %v1557_v19  ;;  %1829 = vmatprep.subr.mxu0 %v1540_v1  ;;  %v751_v19 = vld [vmem:[%s2218_s19 + $0x78] sm:$0x1]  ;;  %v849_v1 = vsel %vm833_vm1, %v838_v45, %v848_v6  ;;  %v1639_v45 = vld [vmem:[%s3001_s1 + $0x7d0] sm:$0xff] }
  0x6b   : > { %1870 = vmatprep.subr.mxu1 %v1572_v5  ;;  %1830 = vmatpush3.msra.mxu0 %v1524_v20  ;;  %v853_v5 = vsel %vm833_vm1, %v844_v49, %v852_v7  ;;  %v1595_v20 = vld [vmem:[%s3001_s1 + $0x670] sm:$0xff]  ;;  %v1638_v49 = vld [vmem:[%s3001_s1 + $0x7c8] sm:$0xff] }
  0x6c   : > { %1871 = vmatpush3.msra.mxu1 %v1556_v21  ;;  %1831 = vmatprep.subr.mxu0 %v1539_v9  ;;  %v1627_v21 = vld [vmem:[%s3001_s1 + $0x770] sm:$0xff]  ;;  %v748_v9 = vld [vmem:[%s2218_s19 + $0x60] sm:$0x1] }
  0x6d   : > { %1872 = vmatprep.subr.mxu1 %v1571_v11  ;;  %1832 = vmatpush3.msra.mxu0 %v1523_v22  ;;  %v750_v11 = vld [vmem:[%s2218_s19 + $0x70] sm:$0x1]  ;;  %v847_v22 = vsel %vm833_vm1, %v835_v50, %v846_v15  ;;  %v1590_v50 = vld [vmem:[%s3001_s1 + $0x648] sm:$0xff] }
  0x6e   : > { %1873 = vmatpush3.msra.mxu1 %v1555_v23  ;;  %1833 = vmatprep.subr.mxu0 %v1538_v24  ;;  %v851_v23 = vsel %vm833_vm1, %v841_v56, %v850_v16  ;;  %v856_v24 = vrot.slane %v749_v18, 5  ;;  %v1604_v56 = vld [vmem:[%s3001_s1 + $0x6b8] sm:$0xff] }
  0x6f   : > { %1874 = vmatprep.subr.mxu1 %v1570_v25  ;;  %1834 = vmatpush3.msra.mxu0 %v1522_v26  ;;  %v860_v25 = vrot.slane %v751_v19, 5  ;;  %v1610_v26 = vld [vmem:[%s3001_s1 + $0x6e8] sm:$0xff]  ;;  %v1584_v18 = vld [vmem:[%s3001_s1 + $0x618] sm:$0xff] }
  0x70   : > { %1875 = vmatpush3.msra.mxu1 %v1554_v27  ;;  %1835 = vmatprep.subr.mxu0 %v1537_v28  ;;  %v1642_v27 = vld [vmem:[%s3001_s1 + $0x7e8] sm:$0xff] }
  0x71   : > { %1876 = vmatprep.subr.mxu1 %v1569_v29  ;;  %1836 = vmatpush3.msra.mxu0 %v1521_v30  ;;  %v1594_v28 = vld [vmem:[%s3001_s1 + $0x668] sm:$0xff]  ;;  %v854_v30 = vrot.slane %v748_v9, 5  ;;  %v861_v35 = vsel %vm833_vm1, %v852_v7, %v860_v25  ;;  %v1037_v9 = vld [vmem:[%s2218_s19] sm:$0xc0] }
  0x72   : > { %1877 = vmatpush3.msra.mxu1 %v1553_v31  ;;  %1837 = vmatprep.subr.mxu0 %v1536_v32  ;;  %v1626_v29 = vld [vmem:[%s3001_s1 + $0x768] sm:$0xff]  ;;  %v858_v31 = vrot.slane %v750_v11, 5  ;;  %v1609_v32 = vld [vmem:[%s3001_s1 + $0x6e0] sm:$0xff]  ;;  %v1039_v11 = vld [vmem:[%s2218_s19 + $0x10] sm:$0xc0] }
  0x73   : > { %1878 = vmatprep.subr.mxu1 %v1568_v33  ;;  %1838 = vmatpush3.msra.mxu0 %v1520_v34  ;;  %v1641_v33 = vld [vmem:[%s3001_s1 + $0x7e0] sm:$0xff]  ;;  %v857_v34 = vsel %vm833_vm1, %v848_v6, %v856_v24  ;;  %v855_v38 = vsel %vm833_vm1, %v846_v15, %v854_v30  ;;  %v1602_v6 = vld [vmem:[%s3001_s1 + $0x6a8] sm:$0xff]  ;;  %v2003_v30 = vld [vmem:[%s2218_s19 + $0x38] sm:$0xff] }
  0x74   : > { %1879 = vmatpush3.msra.mxu1 %v1552_v36  ;;  %1839 = vmatprep.subr.mxu0 %v1535_v37  ;;  %v1593_v36 = vld [vmem:[%s3001_s1 + $0x660] sm:$0xff]  ;;  %v1634_v7 = vld [vmem:[%s3001_s1 + $0x7a8] sm:$0xff] }
  0x75   : > { %1880 = vmatprep.subr.mxu1 %v1567_v39  ;;  %1840 = vmatpush3.msra.mxu0 %v1519_v42  ;;  %v1625_v37 = vld [vmem:[%s3001_s1 + $0x760] sm:$0xff]  ;;  %v859_v39 = vsel %vm833_vm1, %v850_v16, %v858_v31  ;;  %v1592_v42 = vld [vmem:[%s3001_s1 + $0x658] sm:$0xff]  ;;  %v1038_v19 = vld [vmem:[%s2218_s19 + $0x8] sm:$0xc0]  ;;  %v1129_v31 = vrot.slane %v2003_v30, 6 }
  0x76   : > { %1881 = vmatpush3.msra.mxu1 %v1551_v43  ;;  %1841 = vmatprep.subr.mxu0 %v1534_v46  ;;  %v1624_v43 = vld [vmem:[%s3001_s1 + $0x758] sm:$0xff]  ;;  %v1591_v46 = vld [vmem:[%s3001_s1 + $0x650] sm:$0xff]  ;;  %v1617_v15 = vld [vmem:[%s3001_s1 + $0x720] sm:$0xff]  ;;  %v1122_v24 = vrot.slane %v1038_v19, 6 }
  0x77   : > { %1882 = vmatprep.subr.mxu1 %v1566_v47  ;;  %1842 = vmatpush3.msra.mxu0 %v1518_v54  ;;  %v1623_v47 = vld [vmem:[%s3001_s1 + $0x750] sm:$0xff]  ;;  %v1622_v54 = vld [vmem:[%s3001_s1 + $0x748] sm:$0xff]  ;;  %v1600_v16 = vld [vmem:[%s3001_s1 + $0x698] sm:$0xff] }
  0x78   : > { %1883 = vmatpush3.msra.mxu1 %v1550_v51  ;;  %1843 = vmatprep.subr.mxu0 %v1533_v52  ;;  %v1605_v51 = vld [vmem:[%s3001_s1 + $0x6c0] sm:$0xff]  ;;  %v2002_v25 = vld [vmem:[%s2218_s19 + $0x28] sm:$0xff] }
  0x79   : > { %1884 = vmatprep.subr.mxu1 %v1565_v58  ;;  %1844 = vmatpush3.msra.mxu0 %v1517_v61  ;;  %v1637_v52 = vld [vmem:[%s3001_s1 + $0x7c0] sm:$0xff]  ;;  %v1636_v58 = vld [vmem:[%s3001_s1 + $0x7b8] sm:$0xff] }
  0x7a   : > { %938 = vmatprep.mubr.f32.mxu0 %v839_v62  ;;  %1885 = vmatpush3.msra.mxu1 %v1549_v60  ;;  %v1588_v61 = vld [vmem:[%s3001_s1 + $0x638] sm:$0xff]  ;;  %v1603_v60 = vld [vmem:[%s3001_s1 + $0x6b0] sm:$0xff] }
  0x7b   : > { %1018 = vmatprep.mubr.f32.mxu1 %v845_v63  ;;  %939 = vmatmul.mubr.f32.vlgmr.msra.gmra.mxu0 %v836_v3  ;;  %v1620_v62 = vld [vmem:[%s3001_s1 + $0x738] sm:$0xff]  ;;  %v1635_v63 = vld [vmem:[%s3001_s1 + $0x7b0] sm:$0xff] }
  0x7c   : > { %1019 = vmatmul.mubr.f32.vlgmr.msra.gmra.mxu1 %v842_v4  ;;  %1895 = vmatprep.subr.mxu0 %v1612_v8  ;;  %v1587_v3 = vld [vmem:[%s3001_s1 + $0x630] sm:$0xff]  ;;  %v1586_v8 = vld [vmem:[%s3001_s1 + $0x628] sm:$0xff] }
  0x7d   : > { %1936 = vmatprep.subr.mxu1 %v1644_v10  ;;  %1896 = vmatpush3.msra.mxu0 %v1596_v12  ;;  %v1619_v4 = vld [vmem:[%s3001_s1 + $0x730] sm:$0xff]  ;;  %v1618_v10 = vld [vmem:[%s3001_s1 + $0x728] sm:$0xff]  ;;  %v1601_v12 = vld [vmem:[%s3001_s1 + $0x6a0] sm:$0xff] }
  0x7e   : > { %1937 = vmatpush3.msra.mxu1 %v1628_v13  ;;  %1897 = vmatprep.subr.mxu0 %v1611_v14  ;;  %v1633_v13 = vld [vmem:[%s3001_s1 + $0x7a0] sm:$0xff] }
  0x7f   : > { %1938 = vmatprep.subr.mxu1 %v1643_v17  ;;  %943 = vmatprep.mubr.f32.mxu0 %v849_v1  ;;  %v1585_v14 = vld [vmem:[%s3001_s1 + $0x620] sm:$0xff]  ;;  %v1632_v17 = vld [vmem:[%s3001_s1 + $0x798] sm:$0xff] }
  0x80   : > { %1023 = vmatprep.mubr.f32.mxu1 %v853_v5  ;;  %1898 = vmatpush3.msra.mxu0 %v1595_v20  ;;  %v1616_v1 = vld [vmem:[%s3001_s1 + $0x718] sm:$0xff]  ;;  %v1599_v5 = vld [vmem:[%s3001_s1 + $0x690] sm:$0xff] }
  0x81   : > { %1939 = vmatpush3.msra.mxu1 %v1627_v21  ;;  %944 = vmatmul.mubr.f32.gmra.mxu0 %v847_v22  ;;  %v1040_v20 = vld [vmem:[%s2218_s19 + $0x18] sm:$0xc0]  ;;  %v1631_v21 = vld [vmem:[%s3001_s1 + $0x790] sm:$0xff] }
  0x82   : > { %1024 = vmatmul.mubr.f32.gmra.mxu1 %v851_v23  ;;  %1899 = vmatprep.subr.mxu0 %v1610_v26  ;;  %v1583_v22 = vld [vmem:[%s3001_s1 + $0x610] sm:$0xff]  ;;  %v1123_v26 = vrot.slane %v2002_v25, 6 }
  0x83   : > { %1940 = vmatprep.subr.mxu1 %v1642_v27  ;;  %1900 = vmatpush3.msra.mxu0 %v1594_v28  ;;  %v1615_v23 = vld [vmem:[%s3001_s1 + $0x710] sm:$0xff]  ;;  %v1598_v27 = vld [vmem:[%s3001_s1 + $0x688] sm:$0xff] }
  0x84   : > { %1941 = vmatpush3.msra.mxu1 %v1626_v29  ;;  %1901 = vmatprep.subr.mxu0 %v1609_v32  ;;  %v1630_v28 = vld [vmem:[%s3001_s1 + $0x788] sm:$0xff]  ;;  %v1128_v29 = vrot.slane %v1040_v20, 6 }
  0x85   : > { %1942 = vmatprep.subr.mxu1 %v1641_v33  ;;  %948 = vmatprep.mubr.f32.mxu0 %v857_v34  ;;  %v1582_v32 = vld [vmem:[%s3001_s1 + $0x608] sm:$0xff]  ;;  %v1119_v34 = vrot.slane %v1037_v9, 6 }
  0x86   : > { %1028 = vmatprep.mubr.f32.mxu1 %v861_v35  ;;  %1902 = vmatpush3.msra.mxu0 %v1593_v36  ;;  %v1614_v33 = vld [vmem:[%s3001_s1 + $0x708] sm:$0xff]  ;;  %v2004_v35 = vld [vmem:[%s2218_s19 + $0x20] sm:$0xff] }
  0x87   : > { %1943 = vmatpush3.msra.mxu1 %v1625_v37  ;;  %949 = vmatmul.mubr.f32.gmra.mxu0 %v855_v38  ;;  %v1120_v36 = vrot.slane %v2004_v35, 6  ;;  %v1125_v37 = vrot.slane %v1039_v11, 6  ;;  %v2005_v38 = vld [vmem:[%s2218_s19 + $0x30] sm:$0xff] }
  0x88   : > { %1029 = vmatmul.mubr.f32.gmra.mxu1 %v859_v39  ;;  %1903 = vmatprep.subr.mxu0 %v1608_v40  ;;  %v1126_v39 = vrot.slane %v2005_v38, 6  ;;  %v1597_v40 = vld [vmem:[%s3001_s1 + $0x680] sm:$0xff] }
  0x89   : > { %1944 = vmatprep.subr.mxu1 %v1640_v41  ;;  %1904 = vmatpush3.msra.mxu0 %v1592_v42  ;;  %v1629_v41 = vld [vmem:[%s3001_s1 + $0x780] sm:$0xff]  ;;  %v1133_v42 = vrot.slane %v2727_v57, 6 }
  0x8a   : > { %1945 = vmatpush3.msra.mxu1 %v1624_v43  ;;  %1905 = vmatprep.subr.mxu0 %v1607_v44  ;;  %v1137_v43 = vrot.slane %v2730_v59, 6  ;;  %v1581_v44 = vld [vmem:[%s3001_s1 + $0x600] sm:$0xff]  ;;  %v1130_v59 = vsel %vm1118_vm2, %v1128_v29, %v1129_v31 }
  0x8b   : > { %1946 = vmatprep.subr.mxu1 %v1639_v45  ;;  %1906 = vmatpush3.msra.mxu0 %v1591_v46  ;;  %v1124_v45 = vsel %vm1118_vm2, %v1122_v24, %v1123_v26  ;;  %v1042_v46 = vld [vmem:[%s2218_s19 + $0x68] sm:$0x3]  ;;  %v1613_v57 = vld [vmem:[%s3001_s1 + $0x700] sm:$0xff] }
  0x8c   : > { %1947 = vmatpush3.msra.mxu1 %v1623_v47  ;;  %1907 = vmatprep.subr.mxu0 %v1606_v48  ;;  %v1044_v47 = vld [vmem:[%s2218_s19 + $0x78] sm:$0x3]  ;;  %v1121_v48 = vsel %vm1118_vm2, %v1119_v34, %v1120_v36 }
  0x8d   : > { %1948 = vmatprep.subr.mxu1 %v1638_v49  ;;  %1908 = vmatpush3.msra.mxu0 %v1590_v50  ;;  %v1127_v49 = vsel %vm1118_vm2, %v1125_v37, %v1126_v39  ;;  %v1131_v50 = vrot.slane %v2741_v0, 6 }
  0x8e   : > { %1949 = vmatpush3.msra.mxu1 %v1622_v54  ;;  %1909 = vmatprep.subr.mxu0 %v1605_v51  ;;  %v1135_v54 = vrot.slane %v2744_v2, 6  ;;  %v1134_v51 = vsel %vm1118_vm2, %v1123_v26, %v1133_v42 }
  0x8f   : > { %1950 = vmatprep.subr.mxu1 %v1637_v52  ;;  %1910 = vmatpush3.msra.mxu0 %v1589_v53  ;;  %v1138_v52 = vsel %vm1118_vm2, %v1129_v31, %v1137_v43  ;;  %v1141_v53 = vrot.slane %v1042_v46, 6  ;;  %v1132_v0 = vsel %vm1118_vm2, %v1120_v36, %v1131_v50 }
  0x90   : > { %1951 = vmatpush3.msra.mxu1 %v1621_v55  ;;  %1911 = vmatprep.subr.mxu0 %v1604_v56  ;;  %v1145_v55 = vrot.slane %v1044_v47, 6  ;;  %v1041_v56 = vld [vmem:[%s2218_s19 + $0x60] sm:$0x3]  ;;  %v1136_v2 = vsel %vm1118_vm2, %v1126_v39, %v1135_v54 }
  0x91   : > { %1952 = vmatprep.subr.mxu1 %v1636_v58  ;;  %1912 = vmatpush3.msra.mxu0 %v1588_v61  ;;  %v1043_v58 = vld [vmem:[%s2218_s19 + $0x70] sm:$0x3]  ;;  %v1139_v61 = vrot.slane %v1041_v56, 6  ;;  %s1977_s19 = smul.u32 24, %s3009_s12 }
  0x92   : > { %1953 = vmatpush3.msra.mxu1 %v1620_v62  ;;  %1913 = vmatprep.subr.mxu0 %v1603_v60  ;;  %v1143_v62 = vrot.slane %v1043_v58, 6  ;;  %v1142_v60 = vsel %vm1118_vm2, %v1133_v42, %v1141_v53 }
  0x93   : > { %1954 = vmatprep.subr.mxu1 %v1635_v63  ;;  %1914 = vmatpush3.msra.mxu0 %v1587_v3  ;;  %v1146_v63 = vsel %vm1118_vm2, %v1137_v43, %v1145_v55  ;;  %v1140_v3 = vsel %vm1118_vm2, %v1131_v50, %v1139_v61  ;;  %s221_s12 = scalar_lea.vmem %s3003_s3, %s1977_s19 }
  0x94   : > { %1955 = vmatpush3.msra.mxu1 %v1619_v4  ;;  %1915 = vmatprep.subr.mxu0 %v1602_v6  ;;  %v1144_v4 = vsel %vm1118_vm2, %v1135_v54, %v1143_v62 }
  0x95   : > { %1956 = vmatprep.subr.mxu1 %v1634_v7  ;;  %1916 = vmatpush3.msra.mxu0 %v1586_v8 }
  0x96   : > { %1957 = vmatpush3.msra.mxu1 %v1618_v10  ;;  %1917 = vmatprep.subr.mxu0 %v1601_v12 }
  0x97   : > { %1958 = vmatprep.subr.mxu1 %v1633_v13  ;;  %1918 = vmatpush3.msra.mxu0 %v1585_v14 }
  0x98   : > { %1959 = vmatpush3.msra.mxu1 %v1617_v15  ;;  %1919 = vmatprep.subr.mxu0 %v1600_v16 }
  0x99   : > { %1960 = vmatprep.subr.mxu1 %v1632_v17  ;;  %1920 = vmatpush3.msra.mxu0 %v1584_v18 }
  0x9a   : > { %1961 = vmatpush3.msra.mxu1 %v1616_v1  ;;  %1921 = vmatprep.subr.mxu0 %v1599_v5 }
  0x9b   : > { %1962 = vmatprep.subr.mxu1 %v1631_v21  ;;  %1922 = vmatpush3.msra.mxu0 %v1583_v22 }
  0x9c   : > { %1963 = vmatpush3.msra.mxu1 %v1615_v23  ;;  %1923 = vmatprep.subr.mxu0 %v1598_v27 }
  0x9d   : > { %1964 = vmatprep.subr.mxu1 %v1630_v28  ;;  %1924 = vmatpush3.msra.mxu0 %v1582_v32 }
  0x9e   : > { %1965 = vmatpush3.msra.mxu1 %v1614_v33  ;;  %1925 = vmatprep.subr.mxu0 %v1597_v40 }
  0x9f   : > { %1966 = vmatprep.subr.mxu1 %v1629_v41  ;;  %1926 = vmatpush3.msra.mxu0 %v1581_v44 }
  0xa0   : > { %1223 = vmatprep.mubr.f32.mxu0 %v1124_v45  ;;  %1967 = vmatpush3.msra.mxu1 %v1613_v57 }
  0xa1   : > { %1303 = vmatprep.mubr.f32.mxu1 %v1130_v59  ;;  %1224 = vmatmul.mubr.f32.vlgmr.msra.gmra.mxu0 %v1121_v48 }
  0xa2   : > { %1304 = vmatmul.mubr.f32.vlgmr.msra.gmra.mxu1 %v1127_v49  ;;  %1228 = vmatprep.mubr.f32.mxu0 %v1134_v51 }
  0xa3   : > { %1308 = vmatprep.mubr.f32.mxu1 %v1138_v52 }
  0xa5   : > { %1229 = vmatmul.mubr.f32.gmra.mxu0 %v1132_v0 }
  0xa6   : > { %1309 = vmatmul.mubr.f32.gmra.mxu1 %v1136_v2  ;;  %1233 = vmatprep.mubr.f32.mxu0 %v1142_v60 }
  0xa7   : > { %1313 = vmatprep.mubr.f32.mxu1 %v1146_v63 }
  0xa9   : > { %1234 = vmatmul.mubr.f32.gmra.mxu0 %v1140_v3 }
  0xaa   : > { %1314 = vmatmul.mubr.f32.gmra.mxu1 %v1144_v4 }
  0xef   : > { %v1681_v6 = vpop.f32.mrf.mxu0 }
  0xf0   : > { %v1722_v7 = vpop.f32.mrf.mxu1 }
  0xf1   : > { %v1682_v8 = vpop.f32.mrf.mxu0 }
  0xf2   : > { %v1723_v10 = vpop.f32.mrf.mxu1  ;;  %v1683_v36 = vadd.f32 %v1682_v8, %v1681_v6 }
  0xf3   : > { %v1724_v37 = vadd.f32 %v1723_v10, %v1722_v7 }
  0xf5   : > { %v563_v41 = vadd.f32 %v1724_v37, %v1683_v36 }
 0x108   : > { %v1684_v12 = vpop.f32.mrf.mxu0 }
 0x109   : > { %v1725_v13 = vpop.f32.mrf.mxu1 }
 0x10a   : > { %v1685_v14 = vpop.f32.mrf.mxu0 }
 0x10b   : > { %v1726_v15 = vpop.f32.mrf.mxu1  ;;  %v1686_v44 = vadd.f32 %v1685_v14, %v1684_v12 }
 0x10c   : > { %v1727_v45 = vadd.f32 %v1726_v15, %v1725_v13 }
 0x10e   : > { %v1687_v16 = vpop.f32.mrf.mxu0  ;;  %v568_v53 = vadd.f32 %v1727_v45, %v1686_v44 }
 0x10f   : > { %v1728_v17 = vpop.f32.mrf.mxu1 }
 0x110   : > { %v1688_v18 = vpop.f32.mrf.mxu0 }
 0x111   : > { %v1729_v19 = vpop.f32.mrf.mxu1  ;;  %v1689_v48 = vadd.f32 %v1688_v18, %v1687_v16 }
 0x112   : > { %v1730_v49 = vadd.f32 %v1729_v19, %v1728_v17  ;;  %v1645_v17 = vld [vmem:[%s3002_s2] ss:$0 sm:$0xff] }
 0x114   : > { %v573_v4 = vadd.f32 %v1730_v49, %v1689_v48 }
 0x115   : > { %v1763_v1 = vpop.f32.mrf.mxu0 }
 0x116   : > { %v1804_v5 = vpop.f32.mrf.mxu1 }
 0x117   : > { %v1764_v20 = vpop.f32.mrf.mxu0 }
 0x118   : > { %v1805_v21 = vpop.f32.mrf.mxu1  ;;  %v1765_v38 = vadd.f32 %v1764_v20, %v1763_v1 }
 0x119   : > { %v1806_v50 = vadd.f32 %v1805_v21, %v1804_v5 }
 0x11a   : > { %v643_v46 = vadd.f32 %v1765_v38, %v563_v41 }
 0x11b   : > { %v1766_v9 = vpop.f32.mrf.mxu0 }
 0x11c   : > { %v723_v58 = vadd.f32 %v1806_v50, %v643_v46 }
 0x11d   : > { %v1767_v22 = vpop.f32.mrf.mxu0 }
 0x11e   : > { %v1807_v11 = vpop.f32.mrf.mxu1  ;;  %v1768_v59 = vadd.f32 %v1767_v22, %v1766_v9 }
 0x120   : > { %v1808_v23 = vpop.f32.mrf.mxu1  ;;  %v648_v62 = vadd.f32 %v1768_v59, %v568_v53 }
 0x121   : > { %v1769_v24 = vpop.f32.mrf.mxu0  ;;  %v1809_v60 = vadd.f32 %v1808_v23, %v1807_v11 }
 0x123   : > { %v1770_v26 = vpop.f32.mrf.mxu0  ;;  %v728_v1 = vadd.f32 %v1809_v60, %v648_v62 }
 0x124   : > { %v1810_v25 = vpop.f32.mrf.mxu1  ;;  %v1771_v0 = vadd.f32 %v1770_v26, %v1769_v24 }
 0x126   : > { %v1811_v27 = vpop.f32.mrf.mxu1  ;;  %v653_v15 = vadd.f32 %v1771_v0, %v573_v4 }
 0x127   : > { %v1812_v16 = vadd.f32 %v1811_v27, %v1810_v25 }
 0x13b   : > { %v1845_v28 = vpop.f32.mrf.mxu0 }
 0x13c   : > { %v1886_v29 = vpop.f32.mrf.mxu1 }
 0x13d   : > { %v1846_v30 = vpop.f32.mrf.mxu0 }
 0x13e   : > { %v1887_v31 = vpop.f32.mrf.mxu1  ;;  %v1847_v42 = vadd.f32 %v1846_v30, %v1845_v28  ;;  %v733_v28 = vadd.f32 %v1812_v16, %v653_v15 }
 0x13f   : > { %v1888_v43 = vadd.f32 %v1887_v31, %v1886_v29 }
 0x141   : > { %v1848_v32 = vpop.f32.mrf.mxu0  ;;  %v1021_v54 = vadd.f32 %v1888_v43, %v1847_v42 }
 0x142   : > { %v1889_v33 = vpop.f32.mrf.mxu1 }
 0x143   : > { %v1849_v34 = vpop.f32.mrf.mxu0  ;;  %v1034_v6 = vadd.f32 %v1021_v54, %v723_v58 }
 0x144   : > { %v1890_v35 = vpop.f32.mrf.mxu1  ;;  %v1850_v55 = vadd.f32 %v1849_v34, %v1848_v32 }
 0x145   : > { %v1891_v56 = vadd.f32 %v1890_v35, %v1889_v33 }
 0x147   : > { %v1851_v39 = vpop.f32.mrf.mxu0  ;;  %v1026_v10 = vadd.f32 %v1891_v56, %v1850_v55 }
 0x148   : > { %v1892_v40 = vpop.f32.mrf.mxu1 }
 0x149   : > { %v1852_v47 = vpop.f32.mrf.mxu0  ;;  %v1035_v22 = vadd.f32 %v1026_v10, %v728_v1 }
 0x14a   : > { %v1893_v57 = vpop.f32.mrf.mxu1  ;;  %v1853_v12 = vadd.f32 %v1852_v47, %v1851_v39 }
 0x14b   : > { %v1894_v13 = vadd.f32 %v1893_v57, %v1892_v40 }
 0x14d   : > { %v1031_v23 = vadd.f32 %v1894_v13, %v1853_v12 }
 0x14f   : > { %v1036_v33 = vadd.f32 %v1031_v23, %v733_v28 }
 0x161   : > { %v1927_v51 = vpop.f32.mrf.mxu0 }
 0x162   : > { %v1968_v52 = vpop.f32.mrf.mxu1 }
 0x163   : > { %v1928_v2 = vpop.f32.mrf.mxu0 }
 0x164   : > { %v1969_v61 = vpop.f32.mrf.mxu1  ;;  %v1929_v63 = vadd.f32 %v1928_v2, %v1927_v51 }
 0x165   : > { %v1970_v3 = vadd.f32 %v1969_v61, %v1968_v52  ;;  %v1930_v7 = vpop.f32.mrf.mxu0 }
 0x166   : > { %v1971_v8 = vpop.f32.mrf.mxu1 }
 0x167   : > { %v1306_v14 = vadd.f32 %v1970_v3, %v1929_v63  ;;  %v1931_v18 = vpop.f32.mrf.mxu0 }
 0x168   : > { %v1972_v19 = vpop.f32.mrf.mxu1  ;;  %v1932_v20 = vadd.f32 %v1931_v18, %v1930_v7 }
 0x169   : > { %v1319_v5 = vadd.f32 %v1306_v14, %v1034_v6  ;;  %v1973_v21 = vadd.f32 %v1972_v19, %v1971_v8  ;;  %v1933_v9 = vpop.f32.mrf.mxu0 }
 0x16a   : > { %v1974_v11 = vpop.f32.mrf.mxu1 }
 0x16b   : > { %v1329_v24 = vadd.f32 %v1645_v17, %v1319_v5  ;;  %v1311_v26 = vadd.f32 %v1973_v21, %v1932_v20  ;;  %v1934_v25 = vpop.f32.mrf.mxu0 }
 0x16c   : > { %v1975_v27 = vpop.f32.mrf.mxu1  ;;  %v1935_v31 = vadd.f32 %v1934_v25, %v1933_v9 }
 0x16d   : > { %v1332_v29 = vmax.f32 %v1329_v24, 0.0  ;;  %v1320_v30 = vadd.f32 %v1311_v26, %v1035_v22  ;;  %v1976_v32 = vadd.f32 %v1975_v27, %v1974_v11 }
 0x16f   : > { %1335 = vst [vmem:[%s221_s12] sm:$0xff] %v1332_v29  ;;  %v1330_v34 = vadd.f32 %v1645_v17, %v1320_v30  ;;  %v1316_v35 = vadd.f32 %v1976_v32, %v1935_v31 }
 0x171   : > { %v1333_v36 = vmax.f32 %v1330_v34, 0.0  ;;  %v1321_v37 = vadd.f32 %v1316_v35, %v1036_v33 }
 0x173   : > { %1336 = vst [vmem:[%s221_s12 + $0x8] sm:$0xff] %v1333_v36  ;;  %v1331_v38 = vadd.f32 %v1645_v17, %v1321_v37 }
 0x175   : > { %v1334_v39 = vmax.f32 %v1331_v38, 0.0 }
 0x177   : > { %1337 = vst [vmem:[%s221_s12 + $0x10] sm:$0xf] %v1334_v39 }
 0x178 PF: > { %s13_s14 = sadd.s32 1, %s2028_s14   ;;  %s3004_s12 = smov %s2024_s13 }
 0x179   : > { %p10_p5 = scmp.ge.s32.totalorder %s13_s14, 4   ;;  %s3005_s13 = smov %s3007_s15 }
 0x17b   :  { %12 = sbr.rel (!%p10_p5) target bundleno = 2 (0x2), region = 71 }

// kernel: encoder_forward.5
= control target key start
LH: loop header
LB: loop body
LE: loop exit
PB: predicated region body
PF: predicated region fallthrough
CT: control target
= control target key end

     0   :  { %s1790_s12 = smov 0   ;;  %s1792_s13 = smov 0   ;;  %s2638_s0 = inlined_call_operand.vmem [shape: f32[2,10,512], index: 0, kind: input, shape index: {}]   ;;  %s2639_s1 = inlined_call_operand.vmem [shape: f32[4,512,128], index: 1, kind: input, shape index: {}]   ;;  %s2640_s2 = inlined_call_operand.vmem [shape: f32[1,128], index: 2, kind: input, shape index: {}]   ;;  %s2641_s3 = inlined_call_operand.vmem [shape: f32[2,6,128], index: 3, kind: output, shape index: {}]  }
   0x1   :  { %s1794_s14 = smov 0  }
   0x2 LB: > { %s25_s15 = sadd.s32 1, %s1764_s13  ;;  %p1242_p0 = scmp.ge.s32.totalorder %s1768_s14, 1  ;;  %s1768_s14 = sphi %s1794_s14, %s13_s14   ;;  %s1764_s13 = sphi %s1792_s13, %s2643_s13   ;;  %s1760_s12 = sphi %s1790_s12, %s2642_s12  }
   0x3   : > { %p27_p1 = scmp.ge.s32.totalorder %s25_s15, 2  ;;  %p168_p2 = scmp.lt.s32.totalorder %s1768_s14, 3 }
   0x5   : > { %s2645_s15 = smov (%p27_p1, %s25_s15), 0  ;;  %p169_p3 = pnand %p1242_p0, %p168_p2 }
   0x6   : > { %p201_p4 = scmp.lt.s32.totalorder (!%p169_p3), %s1760_s12, 1 }
   0x7   : > { %172 = sbr.rel (%p169_p3) target bundleno = 356 (0x164), region = 32 }
   0xc   : > { %v1277_v0 = vld [vmem:[%s2639_s1 + $0x2f8] sm:$0xff]  ;;  %v1276_v4 = vld [vmem:[%s2639_s1 + $0x2f0] sm:$0xff]  ;;  %v1275_v8 = vld [vmem:[%s2639_s1 + $0x2e8] sm:$0xff]  ;;  %s2647_s12 = smov (!%p201_p4, %s1760_s12), 1  ;;  %vm730_vm0 = vcmask 1044480   ;;  %vm969_vm1 = vcmask 1043456  }
   0xd   : > { %v1309_v1 = vld [vmem:[%s2639_s1 + $0x3f8] sm:$0xff]  ;;  %1442 = vmatprep.subr.mxu0 %v1277_v0  ;;  %v1308_v5 = vld [vmem:[%s2639_s1 + $0x3f0] sm:$0xff]  ;;  %v1307_v9 = vld [vmem:[%s2639_s1 + $0x3e8] sm:$0xff]  ;;  %s1441_s8 = sshll.u32 %s2647_s12, 6  ;;  %s1245_s22 = sshll.u32 %s2647_s12, 3 }
   0xe   : > { %v1261_v2 = vld [vmem:[%s2639_s1 + $0x278] sm:$0xff]  ;;  %1477 = vmatprep.subr.mxu1 %v1309_v1  ;;  %v1260_v6 = vld [vmem:[%s2639_s1 + $0x270] sm:$0xff]  ;;  %v1259_v10 = vld [vmem:[%s2639_s1 + $0x268] sm:$0xff]  ;;  %s1970_s27 = scalar_lea.vmem %s2638_s0, %s1441_s8  ;;  %s219_s25 = scalar_lea.vmem %s2641_s3, %s1245_s22 }
   0xf   : > { %v1293_v3 = vld [vmem:[%s2639_s1 + $0x378] sm:$0xff]  ;;  %1443 = vmatpush3.msra.mxu0 %v1261_v2  ;;  %v1292_v7 = vld [vmem:[%s2639_s1 + $0x370] sm:$0xff]  ;;  %v1291_v11 = vld [vmem:[%s2639_s1 + $0x368] sm:$0xff] }
  0x10   : > { %1478 = vmatpush3.msra.mxu1 %v1293_v3  ;;  %1444 = vmatprep.subr.mxu0 %v1276_v4  ;;  %v1274_v12 = vld [vmem:[%s2639_s1 + $0x2e0] sm:$0xff]  ;;  %v1273_v16 = vld [vmem:[%s2639_s1 + $0x2d8] sm:$0xff]  ;;  %v1272_v20 = vld [vmem:[%s2639_s1 + $0x2d0] sm:$0xff] }
  0x11   : > { %1479 = vmatprep.subr.mxu1 %v1308_v5  ;;  %1445 = vmatpush3.msra.mxu0 %v1260_v6  ;;  %v1306_v13 = vld [vmem:[%s2639_s1 + $0x3e0] sm:$0xff]  ;;  %v1305_v17 = vld [vmem:[%s2639_s1 + $0x3d8] sm:$0xff]  ;;  %v1304_v21 = vld [vmem:[%s2639_s1 + $0x3d0] sm:$0xff] }
  0x12   : > { %1480 = vmatpush3.msra.mxu1 %v1292_v7  ;;  %1446 = vmatprep.subr.mxu0 %v1275_v8  ;;  %v1258_v14 = vld [vmem:[%s2639_s1 + $0x260] sm:$0xff]  ;;  %v1257_v18 = vld [vmem:[%s2639_s1 + $0x258] sm:$0xff]  ;;  %v1256_v22 = vld [vmem:[%s2639_s1 + $0x250] sm:$0xff] }
  0x13   : > { %1481 = vmatprep.subr.mxu1 %v1307_v9  ;;  %v1290_v15 = vld [vmem:[%s2639_s1 + $0x360] sm:$0xff]  ;;  %1447 = vmatpush3.msra.mxu0 %v1259_v10  ;;  %v1289_v19 = vld [vmem:[%s2639_s1 + $0x358] sm:$0xff]  ;;  %v1288_v23 = vld [vmem:[%s2639_s1 + $0x350] sm:$0xff] }
  0x14   : > { %1482 = vmatpush3.msra.mxu1 %v1291_v11  ;;  %1448 = vmatprep.subr.mxu0 %v1274_v12  ;;  %v1271_v24 = vld [vmem:[%s2639_s1 + $0x2c8] sm:$0xff]  ;;  %v1270_v28 = vld [vmem:[%s2639_s1 + $0x2c0] sm:$0xff]  ;;  %v1269_v32 = vld [vmem:[%s2639_s1 + $0x2b8] sm:$0xff] }
  0x15   : > { %1483 = vmatprep.subr.mxu1 %v1306_v13  ;;  %1449 = vmatpush3.msra.mxu0 %v1258_v14  ;;  %v1303_v25 = vld [vmem:[%s2639_s1 + $0x3c8] sm:$0xff]  ;;  %v1302_v29 = vld [vmem:[%s2639_s1 + $0x3c0] sm:$0xff]  ;;  %v1301_v33 = vld [vmem:[%s2639_s1 + $0x3b8] sm:$0xff] }
  0x16   : > { %1484 = vmatpush3.msra.mxu1 %v1290_v15  ;;  %1450 = vmatprep.subr.mxu0 %v1273_v16  ;;  %v1255_v26 = vld [vmem:[%s2639_s1 + $0x248] sm:$0xff]  ;;  %v1254_v30 = vld [vmem:[%s2639_s1 + $0x240] sm:$0xff]  ;;  %v1253_v34 = vld [vmem:[%s2639_s1 + $0x238] sm:$0xff] }
  0x17   : > { %1485 = vmatprep.subr.mxu1 %v1305_v17  ;;  %1451 = vmatpush3.msra.mxu0 %v1257_v18  ;;  %v1287_v27 = vld [vmem:[%s2639_s1 + $0x348] sm:$0xff]  ;;  %v1286_v31 = vld [vmem:[%s2639_s1 + $0x340] sm:$0xff]  ;;  %v1285_v35 = vld [vmem:[%s2639_s1 + $0x338] sm:$0xff] }
  0x18   : > { %1486 = vmatpush3.msra.mxu1 %v1289_v19  ;;  %1452 = vmatprep.subr.mxu0 %v1272_v20  ;;  %v1268_v36 = vld [vmem:[%s2639_s1 + $0x2b0] sm:$0xff]  ;;  %v1267_v40 = vld [vmem:[%s2639_s1 + $0x2a8] sm:$0xff]  ;;  %v1266_v44 = vld [vmem:[%s2639_s1 + $0x2a0] sm:$0xff] }
  0x19   : > { %1487 = vmatprep.subr.mxu1 %v1304_v21  ;;  %1453 = vmatpush3.msra.mxu0 %v1256_v22  ;;  %v1300_v37 = vld [vmem:[%s2639_s1 + $0x3b0] sm:$0xff]  ;;  %v1299_v41 = vld [vmem:[%s2639_s1 + $0x3a8] sm:$0xff]  ;;  %v1298_v45 = vld [vmem:[%s2639_s1 + $0x3a0] sm:$0xff] }
  0x1a   : > { %1488 = vmatpush3.msra.mxu1 %v1288_v23  ;;  %1454 = vmatprep.subr.mxu0 %v1271_v24  ;;  %v1252_v38 = vld [vmem:[%s2639_s1 + $0x230] sm:$0xff]  ;;  %v1251_v42 = vld [vmem:[%s2639_s1 + $0x228] sm:$0xff]  ;;  %v1250_v46 = vld [vmem:[%s2639_s1 + $0x220] sm:$0xff] }
  0x1b   : > { %1489 = vmatprep.subr.mxu1 %v1303_v25  ;;  %1455 = vmatpush3.msra.mxu0 %v1255_v26  ;;  %v1284_v39 = vld [vmem:[%s2639_s1 + $0x330] sm:$0xff]  ;;  %v1283_v43 = vld [vmem:[%s2639_s1 + $0x328] sm:$0xff]  ;;  %v1282_v47 = vld [vmem:[%s2639_s1 + $0x320] sm:$0xff] }
  0x1c   : > { %1490 = vmatpush3.msra.mxu1 %v1287_v27  ;;  %1456 = vmatprep.subr.mxu0 %v1270_v28  ;;  %v1265_v48 = vld [vmem:[%s2639_s1 + $0x298] sm:$0xff]  ;;  %v1264_v52 = vld [vmem:[%s2639_s1 + $0x290] sm:$0xff]  ;;  %v1263_v56 = vld [vmem:[%s2639_s1 + $0x288] sm:$0xff] }
  0x1d   : > { %1491 = vmatprep.subr.mxu1 %v1302_v29  ;;  %1457 = vmatpush3.msra.mxu0 %v1254_v30  ;;  %v1297_v49 = vld [vmem:[%s2639_s1 + $0x398] sm:$0xff]  ;;  %v1296_v53 = vld [vmem:[%s2639_s1 + $0x390] sm:$0xff]  ;;  %v289_v57 = vld [vmem:[%s1970_s27 + $0x8] sm:$0x7e] }
  0x1e   : > { %1492 = vmatpush3.msra.mxu1 %v1286_v31  ;;  %1458 = vmatprep.subr.mxu0 %v1269_v32  ;;  %v1249_v50 = vld [vmem:[%s2639_s1 + $0x218] sm:$0xff]  ;;  %v1248_v54 = vld [vmem:[%s2639_s1 + $0x210] sm:$0xff]  ;;  %v1295_v58 = vld [vmem:[%s2639_s1 + $0x388] sm:$0xff]  ;;  %v362_v2 = vrot.slane %v289_v57, 1 }
  0x1f   : > { %1493 = vmatprep.subr.mxu1 %v1301_v33  ;;  %1459 = vmatpush3.msra.mxu0 %v1253_v34  ;;  %v1281_v51 = vld [vmem:[%s2639_s1 + $0x318] sm:$0xff]  ;;  %v1280_v55 = vld [vmem:[%s2639_s1 + $0x310] sm:$0xff]  ;;  %v1247_v59 = vld [vmem:[%s2639_s1 + $0x208] sm:$0xff] }
  0x20   : > { %1494 = vmatpush3.msra.mxu1 %v1285_v35  ;;  %1460 = vmatprep.subr.mxu0 %v1268_v36  ;;  %v291_v60 = vld [vmem:[%s1970_s27 + $0x18] sm:$0x7e]  ;;  %v1279_v61 = vld [vmem:[%s2639_s1 + $0x308] sm:$0xff]  ;;  %v288_v62 = vld [vmem:[%s1970_s27] sm:$0x7e] }
  0x21   : > { %1495 = vmatprep.subr.mxu1 %v1300_v37  ;;  %1461 = vmatpush3.msra.mxu0 %v1252_v38  ;;  %v290_v63 = vld [vmem:[%s1970_s27 + $0x10] sm:$0x7e]  ;;  %v1262_v0 = vld [vmem:[%s2639_s1 + $0x280] sm:$0xff]  ;;  %v364_v4 = vrot.slane %v291_v60, 1  ;;  %v361_v6 = vrot.slane %v288_v62, 1  ;;  %v255_v8 = vld [vmem:[%s2639_s1 + $0xf8] sm:$0xff] }
  0x22   : > { %1496 = vmatpush3.msra.mxu1 %v1284_v39  ;;  %1462 = vmatprep.subr.mxu0 %v1267_v40  ;;  %v1294_v1 = vld [vmem:[%s2639_s1 + $0x380] sm:$0xff]  ;;  %v363_v7 = vrot.slane %v290_v63, 1  ;;  %v287_v9 = vld [vmem:[%s2639_s1 + $0x1f8] sm:$0xff]  ;;  %v254_v12 = vld [vmem:[%s2639_s1 + $0xf0] sm:$0xff] }
  0x23   : > { %1497 = vmatprep.subr.mxu1 %v1299_v41  ;;  %1463 = vmatpush3.msra.mxu0 %v1251_v42  ;;  %v1246_v3 = vld [vmem:[%s2639_s1 + $0x200] sm:$0xff]  ;;  %v239_v10 = vld [vmem:[%s2639_s1 + $0x78] sm:$0xff]  ;;  %v286_v13 = vld [vmem:[%s2639_s1 + $0x1f0] sm:$0xff] }
  0x24   : > { %1498 = vmatpush3.msra.mxu1 %v1283_v43  ;;  %1464 = vmatprep.subr.mxu0 %v1266_v44  ;;  %v1278_v5 = vld [vmem:[%s2639_s1 + $0x300] sm:$0xff]  ;;  %v271_v11 = vld [vmem:[%s2639_s1 + $0x178] sm:$0xff]  ;;  %v238_v14 = vld [vmem:[%s2639_s1 + $0x70] sm:$0xff] }
  0x25   : > { %1499 = vmatprep.subr.mxu1 %v1298_v45  ;;  %1465 = vmatpush3.msra.mxu0 %v1250_v46  ;;  %v270_v15 = vld [vmem:[%s2639_s1 + $0x170] sm:$0xff]  ;;  %v253_v16 = vld [vmem:[%s2639_s1 + $0xe8] sm:$0xff]  ;;  %v252_v20 = vld [vmem:[%s2639_s1 + $0xe0] sm:$0xff] }
  0x26   : > { %1500 = vmatpush3.msra.mxu1 %v1282_v47  ;;  %1466 = vmatprep.subr.mxu0 %v1265_v48  ;;  %v285_v17 = vld [vmem:[%s2639_s1 + $0x1e8] sm:$0xff]  ;;  %v284_v21 = vld [vmem:[%s2639_s1 + $0x1e0] sm:$0xff]  ;;  %v251_v24 = vld [vmem:[%s2639_s1 + $0xd8] sm:$0xff] }
  0x27   : > { %1501 = vmatprep.subr.mxu1 %v1297_v49  ;;  %1467 = vmatpush3.msra.mxu0 %v1249_v50  ;;  %v237_v18 = vld [vmem:[%s2639_s1 + $0x68] sm:$0xff]  ;;  %v236_v22 = vld [vmem:[%s2639_s1 + $0x60] sm:$0xff]  ;;  %v283_v25 = vld [vmem:[%s2639_s1 + $0x1d8] sm:$0xff] }
  0x28   : > { %1502 = vmatpush3.msra.mxu1 %v1281_v51  ;;  %1468 = vmatprep.subr.mxu0 %v1264_v52  ;;  %v269_v19 = vld [vmem:[%s2639_s1 + $0x168] sm:$0xff]  ;;  %v268_v23 = vld [vmem:[%s2639_s1 + $0x160] sm:$0xff]  ;;  %v235_v26 = vld [vmem:[%s2639_s1 + $0x58] sm:$0xff] }
  0x29   : > { %1503 = vmatprep.subr.mxu1 %v1296_v53  ;;  %1469 = vmatpush3.msra.mxu0 %v1248_v54  ;;  %v267_v27 = vld [vmem:[%s2639_s1 + $0x158] sm:$0xff]  ;;  %v250_v28 = vld [vmem:[%s2639_s1 + $0xd0] sm:$0xff]  ;;  %v249_v32 = vld [vmem:[%s2639_s1 + $0xc8] sm:$0xff] }
  0x2a   : > { %1504 = vmatpush3.msra.mxu1 %v1280_v55  ;;  %1470 = vmatprep.subr.mxu0 %v1263_v56  ;;  %v282_v29 = vld [vmem:[%s2639_s1 + $0x1d0] sm:$0xff]  ;;  %v281_v33 = vld [vmem:[%s2639_s1 + $0x1c8] sm:$0xff]  ;;  %v248_v36 = vld [vmem:[%s2639_s1 + $0xc0] sm:$0xff] }
  0x2b   : > { %1505 = vmatprep.subr.mxu1 %v1295_v58  ;;  %1471 = vmatpush3.msra.mxu0 %v1247_v59  ;;  %v234_v30 = vld [vmem:[%s2639_s1 + $0x50] sm:$0xff]  ;;  %v233_v34 = vld [vmem:[%s2639_s1 + $0x48] sm:$0xff]  ;;  %v280_v37 = vld [vmem:[%s2639_s1 + $0x1c0] sm:$0xff] }
  0x2c   : > { %1506 = vmatpush3.msra.mxu1 %v1279_v61  ;;  %1472 = vmatprep.subr.mxu0 %v1262_v0  ;;  %v266_v31 = vld [vmem:[%s2639_s1 + $0x150] sm:$0xff]  ;;  %v265_v35 = vld [vmem:[%s2639_s1 + $0x148] sm:$0xff]  ;;  %v232_v38 = vld [vmem:[%s2639_s1 + $0x40] sm:$0xff] }
  0x2d   : > { %1507 = vmatprep.subr.mxu1 %v1294_v1  ;;  %1473 = vmatpush3.msra.mxu0 %v1246_v3  ;;  %v264_v39 = vld [vmem:[%s2639_s1 + $0x140] sm:$0xff]  ;;  %v247_v40 = vld [vmem:[%s2639_s1 + $0xb8] sm:$0xff]  ;;  %v246_v44 = vld [vmem:[%s2639_s1 + $0xb0] sm:$0xff] }
  0x2e   : > { %433 = vmatprep.mubr.f32.mxu0 %v362_v2  ;;  %1508 = vmatpush3.msra.mxu1 %v1278_v5  ;;  %v279_v41 = vld [vmem:[%s2639_s1 + $0x1b8] sm:$0xff]  ;;  %v278_v45 = vld [vmem:[%s2639_s1 + $0x1b0] sm:$0xff]  ;;  %v245_v48 = vld [vmem:[%s2639_s1 + $0xa8] sm:$0xff] }
  0x2f   : > { %503 = vmatprep.mubr.f32.mxu1 %v364_v4  ;;  %434 = vmatmul.mubr.f32.vlgmr.msra.gmra.mxu0 %v361_v6  ;;  %v231_v42 = vld [vmem:[%s2639_s1 + $0x38] sm:$0xff]  ;;  %v230_v46 = vld [vmem:[%s2639_s1 + $0x30] sm:$0xff]  ;;  %v277_v49 = vld [vmem:[%s2639_s1 + $0x1a8] sm:$0xff] }
  0x30   : > { %504 = vmatmul.mubr.f32.vlgmr.msra.gmra.mxu1 %v363_v7  ;;  %1512 = vmatprep.subr.mxu0 %v255_v8  ;;  %v263_v43 = vld [vmem:[%s2639_s1 + $0x138] sm:$0xff]  ;;  %v262_v47 = vld [vmem:[%s2639_s1 + $0x130] sm:$0xff]  ;;  %v229_v50 = vld [vmem:[%s2639_s1 + $0x28] sm:$0xff] }
  0x31   : > { %1547 = vmatprep.subr.mxu1 %v287_v9  ;;  %1513 = vmatpush3.msra.mxu0 %v239_v10  ;;  %v261_v51 = vld [vmem:[%s2639_s1 + $0x128] sm:$0xff]  ;;  %v244_v52 = vld [vmem:[%s2639_s1 + $0xa0] sm:$0xff]  ;;  %v243_v56 = vld [vmem:[%s2639_s1 + $0x98] sm:$0xff] }
  0x32   : > { %1548 = vmatpush3.msra.mxu1 %v271_v11  ;;  %1514 = vmatprep.subr.mxu0 %v254_v12  ;;  %v276_v53 = vld [vmem:[%s2639_s1 + $0x1a0] sm:$0xff]  ;;  %v275_v57 = vld [vmem:[%s2639_s1 + $0x198] sm:$0xff]  ;;  %v242_v60 = vld [vmem:[%s2639_s1 + $0x90] sm:$0xff] }
  0x33   : > { %1549 = vmatprep.subr.mxu1 %v286_v13  ;;  %1515 = vmatpush3.msra.mxu0 %v238_v14  ;;  %v228_v54 = vld [vmem:[%s2639_s1 + $0x20] sm:$0xff]  ;;  %v227_v58 = vld [vmem:[%s2639_s1 + $0x18] sm:$0xff]  ;;  %v274_v61 = vld [vmem:[%s2639_s1 + $0x190] sm:$0xff] }
  0x34   : > { %1550 = vmatpush3.msra.mxu1 %v270_v15  ;;  %1516 = vmatprep.subr.mxu0 %v253_v16  ;;  %v260_v55 = vld [vmem:[%s2639_s1 + $0x120] sm:$0xff]  ;;  %v259_v59 = vld [vmem:[%s2639_s1 + $0x118] sm:$0xff]  ;;  %v226_v62 = vld [vmem:[%s2639_s1 + $0x10] sm:$0xff] }
  0x35   : > { %1551 = vmatprep.subr.mxu1 %v285_v17  ;;  %1517 = vmatpush3.msra.mxu0 %v237_v18  ;;  %v258_v63 = vld [vmem:[%s2639_s1 + $0x110] sm:$0xff]  ;;  %v241_v0 = vld [vmem:[%s2639_s1 + $0x88] sm:$0xff]  ;;  %v240_v4 = vld [vmem:[%s2639_s1 + $0x80] sm:$0xff] }
  0x36   : > { %1552 = vmatpush3.msra.mxu1 %v269_v19  ;;  %1518 = vmatprep.subr.mxu0 %v252_v20  ;;  %v273_v1 = vld [vmem:[%s2639_s1 + $0x188] sm:$0xff]  ;;  %v272_v5 = vld [vmem:[%s2639_s1 + $0x180] sm:$0xff]  ;;  %v223_v9 = vld [vmem:[%s1970_s27 + $0x18] sm:$0x3f] }
  0x37   : > { %1553 = vmatprep.subr.mxu1 %v284_v21  ;;  %1519 = vmatpush3.msra.mxu0 %v236_v22  ;;  %v225_v2 = vld [vmem:[%s2639_s1 + $0x8] sm:$0xff]  ;;  %v224_v6 = vld [vmem:[%s2639_s1] sm:$0xff]  ;;  %v222_v11 = vld [vmem:[%s1970_s27 + $0x10] sm:$0x3f] }
  0x38   : > { %1554 = vmatpush3.msra.mxu1 %v268_v23  ;;  %1520 = vmatprep.subr.mxu0 %v251_v24  ;;  %v257_v3 = vld [vmem:[%s2639_s1 + $0x108] sm:$0xff]  ;;  %v256_v8 = vld [vmem:[%s2639_s1 + $0x100] sm:$0xff]  ;;  %v1341_v12 = vld [vmem:[%s2639_s1 + $0x4f8] sm:$0xff] }
  0x39   : > { %1555 = vmatprep.subr.mxu1 %v283_v25  ;;  %1521 = vmatpush3.msra.mxu0 %v235_v26  ;;  %v221_v7 = vld [vmem:[%s1970_s27 + $0x8] sm:$0x3f]  ;;  %v220_v10 = vld [vmem:[%s1970_s27] sm:$0x3f]  ;;  %v1373_v13 = vld [vmem:[%s2639_s1 + $0x5f8] sm:$0xff] }
  0x3a   : > { %1556 = vmatpush3.msra.mxu1 %v267_v27  ;;  %1522 = vmatprep.subr.mxu0 %v250_v28  ;;  %v1325_v14 = vld [vmem:[%s2639_s1 + $0x478] sm:$0xff]  ;;  %v1340_v16 = vld [vmem:[%s2639_s1 + $0x4f0] sm:$0xff]  ;;  %v1339_v20 = vld [vmem:[%s2639_s1 + $0x4e8] sm:$0xff] }
  0x3b   : > { %1557 = vmatprep.subr.mxu1 %v282_v29  ;;  %1523 = vmatpush3.msra.mxu0 %v234_v30  ;;  %v1357_v15 = vld [vmem:[%s2639_s1 + $0x578] sm:$0xff]  ;;  %v1372_v17 = vld [vmem:[%s2639_s1 + $0x5f0] sm:$0xff]  ;;  %v1371_v21 = vld [vmem:[%s2639_s1 + $0x5e8] sm:$0xff] }
  0x3c   : > { %1558 = vmatpush3.msra.mxu1 %v266_v31  ;;  %1524 = vmatprep.subr.mxu0 %v249_v32  ;;  %v1324_v18 = vld [vmem:[%s2639_s1 + $0x470] sm:$0xff]  ;;  %v1323_v22 = vld [vmem:[%s2639_s1 + $0x468] sm:$0xff]  ;;  %v1338_v24 = vld [vmem:[%s2639_s1 + $0x4e0] sm:$0xff] }
  0x3d   : > { %1559 = vmatprep.subr.mxu1 %v281_v33  ;;  %1525 = vmatpush3.msra.mxu0 %v233_v34  ;;  %v1356_v19 = vld [vmem:[%s2639_s1 + $0x570] sm:$0xff]  ;;  %v1355_v23 = vld [vmem:[%s2639_s1 + $0x568] sm:$0xff]  ;;  %v1370_v25 = vld [vmem:[%s2639_s1 + $0x5e0] sm:$0xff] }
  0x3e   : > { %1560 = vmatpush3.msra.mxu1 %v265_v35  ;;  %1526 = vmatprep.subr.mxu0 %v248_v36  ;;  %v1322_v26 = vld [vmem:[%s2639_s1 + $0x460] sm:$0xff]  ;;  %v1337_v28 = vld [vmem:[%s2639_s1 + $0x4d8] sm:$0xff]  ;;  %v1336_v32 = vld [vmem:[%s2639_s1 + $0x4d0] sm:$0xff] }
  0x3f   : > { %1561 = vmatprep.subr.mxu1 %v280_v37  ;;  %1527 = vmatpush3.msra.mxu0 %v232_v38  ;;  %v1354_v27 = vld [vmem:[%s2639_s1 + $0x560] sm:$0xff]  ;;  %v1369_v29 = vld [vmem:[%s2639_s1 + $0x5d8] sm:$0xff]  ;;  %v1368_v33 = vld [vmem:[%s2639_s1 + $0x5d0] sm:$0xff] }
  0x40   : > { %1562 = vmatpush3.msra.mxu1 %v264_v39  ;;  %1528 = vmatprep.subr.mxu0 %v247_v40  ;;  %v1321_v30 = vld [vmem:[%s2639_s1 + $0x458] sm:$0xff]  ;;  %v1320_v34 = vld [vmem:[%s2639_s1 + $0x450] sm:$0xff]  ;;  %v1335_v36 = vld [vmem:[%s2639_s1 + $0x4c8] sm:$0xff] }
  0x41   : > { %1563 = vmatprep.subr.mxu1 %v279_v41  ;;  %1529 = vmatpush3.msra.mxu0 %v231_v42  ;;  %v1353_v31 = vld [vmem:[%s2639_s1 + $0x558] sm:$0xff]  ;;  %v1352_v35 = vld [vmem:[%s2639_s1 + $0x550] sm:$0xff]  ;;  %v1367_v37 = vld [vmem:[%s2639_s1 + $0x5c8] sm:$0xff] }
  0x42   : > { %1564 = vmatpush3.msra.mxu1 %v263_v43  ;;  %1530 = vmatprep.subr.mxu0 %v246_v44  ;;  %v1319_v38 = vld [vmem:[%s2639_s1 + $0x448] sm:$0xff]  ;;  %v1334_v40 = vld [vmem:[%s2639_s1 + $0x4c0] sm:$0xff]  ;;  %v1333_v44 = vld [vmem:[%s2639_s1 + $0x4b8] sm:$0xff] }
  0x43   : > { %1565 = vmatprep.subr.mxu1 %v278_v45  ;;  %1531 = vmatpush3.msra.mxu0 %v230_v46  ;;  %v1351_v39 = vld [vmem:[%s2639_s1 + $0x548] sm:$0xff]  ;;  %v1366_v41 = vld [vmem:[%s2639_s1 + $0x5c0] sm:$0xff]  ;;  %v1365_v45 = vld [vmem:[%s2639_s1 + $0x5b8] sm:$0xff] }
  0x44   : > { %1566 = vmatpush3.msra.mxu1 %v262_v47  ;;  %1532 = vmatprep.subr.mxu0 %v245_v48  ;;  %v1318_v42 = vld [vmem:[%s2639_s1 + $0x440] sm:$0xff]  ;;  %v1317_v46 = vld [vmem:[%s2639_s1 + $0x438] sm:$0xff]  ;;  %v1332_v48 = vld [vmem:[%s2639_s1 + $0x4b0] sm:$0xff] }
  0x45   : > { %1567 = vmatprep.subr.mxu1 %v277_v49  ;;  %1533 = vmatpush3.msra.mxu0 %v229_v50  ;;  %v1350_v43 = vld [vmem:[%s2639_s1 + $0x540] sm:$0xff]  ;;  %v1349_v47 = vld [vmem:[%s2639_s1 + $0x538] sm:$0xff]  ;;  %v1364_v49 = vld [vmem:[%s2639_s1 + $0x5b0] sm:$0xff] }
  0x46   : > { %1568 = vmatpush3.msra.mxu1 %v261_v51  ;;  %1534 = vmatprep.subr.mxu0 %v244_v52  ;;  %v1316_v50 = vld [vmem:[%s2639_s1 + $0x430] sm:$0xff]  ;;  %v1331_v52 = vld [vmem:[%s2639_s1 + $0x4a8] sm:$0xff] }
  0x47   : > { %1569 = vmatprep.subr.mxu1 %v276_v53  ;;  %1535 = vmatpush3.msra.mxu0 %v228_v54  ;;  %v1348_v51 = vld [vmem:[%s2639_s1 + $0x530] sm:$0xff]  ;;  %v1363_v53 = vld [vmem:[%s2639_s1 + $0x5a8] sm:$0xff] }
  0x48   : > { %1570 = vmatpush3.msra.mxu1 %v260_v55  ;;  %1536 = vmatprep.subr.mxu0 %v243_v56  ;;  %v1315_v54 = vld [vmem:[%s2639_s1 + $0x428] sm:$0xff]  ;;  %v1330_v56 = vld [vmem:[%s2639_s1 + $0x4a0] sm:$0xff] }
  0x49   : > { %1571 = vmatprep.subr.mxu1 %v275_v57  ;;  %1537 = vmatpush3.msra.mxu0 %v227_v58  ;;  %v1347_v55 = vld [vmem:[%s2639_s1 + $0x528] sm:$0xff]  ;;  %v1362_v57 = vld [vmem:[%s2639_s1 + $0x5a0] sm:$0xff] }
  0x4a   : > { %1572 = vmatpush3.msra.mxu1 %v259_v59  ;;  %1538 = vmatprep.subr.mxu0 %v242_v60  ;;  %v1314_v58 = vld [vmem:[%s2639_s1 + $0x420] sm:$0xff]  ;;  %v1329_v60 = vld [vmem:[%s2639_s1 + $0x498] sm:$0xff] }
  0x4b   : > { %1573 = vmatprep.subr.mxu1 %v274_v61  ;;  %1539 = vmatpush3.msra.mxu0 %v226_v62  ;;  %v1346_v59 = vld [vmem:[%s2639_s1 + $0x520] sm:$0xff]  ;;  %v1361_v61 = vld [vmem:[%s2639_s1 + $0x598] sm:$0xff] }
  0x4c   : > { %1574 = vmatpush3.msra.mxu1 %v258_v63  ;;  %1540 = vmatprep.subr.mxu0 %v241_v0  ;;  %v1313_v62 = vld [vmem:[%s2639_s1 + $0x418] sm:$0xff]  ;;  %v1328_v0 = vld [vmem:[%s2639_s1 + $0x490] sm:$0xff] }
  0x4d   : > { %1575 = vmatprep.subr.mxu1 %v273_v1  ;;  %1541 = vmatpush3.msra.mxu0 %v225_v2  ;;  %v1345_v63 = vld [vmem:[%s2639_s1 + $0x518] sm:$0xff]  ;;  %v1360_v1 = vld [vmem:[%s2639_s1 + $0x590] sm:$0xff]  ;;  %v650_v2 = vld [vmem:[%s1970_s27 + $0x8] sm:$0xf8] }
  0x4e   : > { %1576 = vmatpush3.msra.mxu1 %v257_v3  ;;  %1542 = vmatprep.subr.mxu0 %v240_v4  ;;  %v654_v3 = vld [vmem:[%s1970_s27 + $0x28] sm:$0x1]  ;;  %v652_v4 = vld [vmem:[%s1970_s27 + $0x18] sm:$0xf8] }
  0x4f   : > { %1577 = vmatprep.subr.mxu1 %v272_v5  ;;  %1543 = vmatpush3.msra.mxu0 %v224_v6  ;;  %v656_v5 = vld [vmem:[%s1970_s27 + $0x38] sm:$0x1]  ;;  %v649_v6 = vld [vmem:[%s1970_s27] sm:$0xf8] }
  0x50   : > { %573 = vmatprep.mubr.f32.mxu0 %v221_v7  ;;  %1578 = vmatpush3.msra.mxu1 %v256_v8  ;;  %v653_v7 = vld [vmem:[%s1970_s27 + $0x20] sm:$0x1]  ;;  %v651_v8 = vld [vmem:[%s1970_s27 + $0x10] sm:$0xf8] }
  0x51   : > { %643 = vmatprep.mubr.f32.mxu1 %v223_v9  ;;  %574 = vmatmul.mubr.f32.vlgmr.msra.gmra.mxu0 %v220_v10  ;;  %v655_v9 = vld [vmem:[%s1970_s27 + $0x30] sm:$0x1] }
  0x52   : > { %644 = vmatmul.mubr.f32.vlgmr.msra.gmra.mxu1 %v222_v11  ;;  %1582 = vmatprep.subr.mxu0 %v1341_v12  ;;  %v1312_v10 = vld [vmem:[%s2639_s1 + $0x410] sm:$0xff]  ;;  %v734_v12 = vrot.slane %v650_v2, 3  ;;  %v1381_v2 = vld [vmem:[%s2639_s1 + $0x638] sm:$0xff] }
  0x53   : > { %1617 = vmatprep.subr.mxu1 %v1373_v13  ;;  %1583 = vmatpush3.msra.mxu0 %v1325_v14  ;;  %v1344_v11 = vld [vmem:[%s2639_s1 + $0x510] sm:$0xff]  ;;  %v735_v13 = vrot.slane %v654_v3, 3  ;;  %v1327_v14 = vld [vmem:[%s2639_s1 + $0x488] sm:$0xff]  ;;  %v1413_v3 = vld [vmem:[%s2639_s1 + $0x738] sm:$0xff] }
  0x54   : > { %1618 = vmatpush3.msra.mxu1 %v1357_v15  ;;  %1584 = vmatprep.subr.mxu0 %v1340_v16  ;;  %v1359_v15 = vld [vmem:[%s2639_s1 + $0x588] sm:$0xff]  ;;  %v740_v16 = vrot.slane %v652_v4, 3  ;;  %v1396_v4 = vld [vmem:[%s2639_s1 + $0x6b0] sm:$0xff] }
  0x55   : > { %1619 = vmatprep.subr.mxu1 %v1372_v17  ;;  %1585 = vmatpush3.msra.mxu0 %v1324_v18  ;;  %v741_v17 = vrot.slane %v656_v5, 3  ;;  %v1311_v18 = vld [vmem:[%s2639_s1 + $0x408] sm:$0xff]  ;;  %v1428_v5 = vld [vmem:[%s2639_s1 + $0x7b0] sm:$0xff] }
  0x56   : > { %1620 = vmatpush3.msra.mxu1 %v1356_v19  ;;  %1586 = vmatprep.subr.mxu0 %v1339_v20  ;;  %v1343_v19 = vld [vmem:[%s2639_s1 + $0x508] sm:$0xff]  ;;  %v731_v20 = vrot.slane %v649_v6, 3  ;;  %v1380_v6 = vld [vmem:[%s2639_s1 + $0x630] sm:$0xff] }
  0x57   : > { %1621 = vmatprep.subr.mxu1 %v1371_v21  ;;  %1587 = vmatpush3.msra.mxu0 %v1323_v22  ;;  %v732_v21 = vrot.slane %v653_v7, 3  ;;  %v737_v22 = vrot.slane %v651_v8, 3  ;;  %v1412_v7 = vld [vmem:[%s2639_s1 + $0x730] sm:$0xff]  ;;  %v1395_v8 = vld [vmem:[%s2639_s1 + $0x6a8] sm:$0xff] }
  0x58   : > { %1622 = vmatpush3.msra.mxu1 %v1355_v23  ;;  %1588 = vmatprep.subr.mxu0 %v1338_v24  ;;  %v738_v23 = vrot.slane %v655_v9, 3  ;;  %v1326_v24 = vld [vmem:[%s2639_s1 + $0x480] sm:$0xff]  ;;  %v1427_v9 = vld [vmem:[%s2639_s1 + $0x7a8] sm:$0xff] }
  0x59   : > { %1623 = vmatprep.subr.mxu1 %v1370_v25  ;;  %1589 = vmatpush3.msra.mxu0 %v1322_v26  ;;  %v1358_v25 = vld [vmem:[%s2639_s1 + $0x580] sm:$0xff] }
  0x5a   : > { %1624 = vmatpush3.msra.mxu1 %v1354_v27  ;;  %1590 = vmatprep.subr.mxu0 %v1337_v28  ;;  %v1310_v26 = vld [vmem:[%s2639_s1 + $0x400] sm:$0xff]  ;;  %v736_v27 = vsel %vm730_vm0, %v734_v12, %v735_v13 }
  0x5b   : > { %1625 = vmatprep.subr.mxu1 %v1369_v29  ;;  %1591 = vmatpush3.msra.mxu0 %v1321_v30  ;;  %v1342_v28 = vld [vmem:[%s2639_s1 + $0x500] sm:$0xff]  ;;  %v742_v29 = vsel %vm730_vm0, %v740_v16, %v741_v17  ;;  %v733_v30 = vsel %vm730_vm0, %v731_v20, %v732_v21  ;;  %v1393_v16 = vld [vmem:[%s2639_s1 + $0x698] sm:$0xff]  ;;  %v1392_v20 = vld [vmem:[%s2639_s1 + $0x690] sm:$0xff] }
  0x5c   : > { %1626 = vmatpush3.msra.mxu1 %v1353_v31  ;;  %1592 = vmatprep.subr.mxu0 %v1336_v32  ;;  %v739_v31 = vsel %vm730_vm0, %v737_v22, %v738_v23  ;;  %v1405_v32 = vld [vmem:[%s2639_s1 + $0x6f8] sm:$0xff]  ;;  %v1394_v12 = vld [vmem:[%s2639_s1 + $0x6a0] sm:$0xff]  ;;  %v1424_v21 = vld [vmem:[%s2639_s1 + $0x790] sm:$0xff] }
  0x5d   : > { %1627 = vmatprep.subr.mxu1 %v1368_v33  ;;  %1593 = vmatpush3.msra.mxu0 %v1320_v34  ;;  %v1437_v33 = vld [vmem:[%s2639_s1 + $0x7f8] sm:$0xff]  ;;  %v1426_v13 = vld [vmem:[%s2639_s1 + $0x7a0] sm:$0xff]  ;;  %v889_v22 = vld [vmem:[%s1970_s27 + $0x8] sm:$0xf0] }
  0x5e   : > { %1628 = vmatpush3.msra.mxu1 %v1352_v35  ;;  %1594 = vmatprep.subr.mxu0 %v1335_v36  ;;  %v1389_v34 = vld [vmem:[%s2639_s1 + $0x678] sm:$0xff]  ;;  %v1404_v36 = vld [vmem:[%s2639_s1 + $0x6f0] sm:$0xff]  ;;  %v893_v23 = vld [vmem:[%s1970_s27 + $0x28] sm:$0x3] }
  0x5f   : > { %1629 = vmatprep.subr.mxu1 %v1367_v37  ;;  %1595 = vmatpush3.msra.mxu0 %v1319_v38  ;;  %v1421_v35 = vld [vmem:[%s2639_s1 + $0x778] sm:$0xff]  ;;  %v1436_v37 = vld [vmem:[%s2639_s1 + $0x7f0] sm:$0xff] }
  0x60   : > { %1630 = vmatpush3.msra.mxu1 %v1351_v39  ;;  %1596 = vmatprep.subr.mxu0 %v1334_v40  ;;  %v1388_v38 = vld [vmem:[%s2639_s1 + $0x670] sm:$0xff]  ;;  %v1403_v40 = vld [vmem:[%s2639_s1 + $0x6e8] sm:$0xff]  ;;  %v1425_v17 = vld [vmem:[%s2639_s1 + $0x798] sm:$0xff] }
  0x61   : > { %1631 = vmatprep.subr.mxu1 %v1366_v41  ;;  %1597 = vmatpush3.msra.mxu0 %v1318_v42  ;;  %v1420_v39 = vld [vmem:[%s2639_s1 + $0x770] sm:$0xff]  ;;  %v1435_v41 = vld [vmem:[%s2639_s1 + $0x7e8] sm:$0xff] }
  0x62   : > { %1632 = vmatpush3.msra.mxu1 %v1350_v43  ;;  %1598 = vmatprep.subr.mxu0 %v1333_v44  ;;  %v1387_v42 = vld [vmem:[%s2639_s1 + $0x668] sm:$0xff]  ;;  %v1402_v44 = vld [vmem:[%s2639_s1 + $0x6e0] sm:$0xff] }
  0x63   : > { %1633 = vmatprep.subr.mxu1 %v1365_v45  ;;  %1599 = vmatpush3.msra.mxu0 %v1317_v46  ;;  %v1419_v43 = vld [vmem:[%s2639_s1 + $0x768] sm:$0xff]  ;;  %v1434_v45 = vld [vmem:[%s2639_s1 + $0x7e0] sm:$0xff] }
  0x64   : > { %1634 = vmatpush3.msra.mxu1 %v1349_v47  ;;  %1600 = vmatprep.subr.mxu0 %v1332_v48  ;;  %v1386_v46 = vld [vmem:[%s2639_s1 + $0x660] sm:$0xff]  ;;  %v1401_v48 = vld [vmem:[%s2639_s1 + $0x6d8] sm:$0xff] }
  0x65   : > { %1635 = vmatprep.subr.mxu1 %v1364_v49  ;;  %1601 = vmatpush3.msra.mxu0 %v1316_v50  ;;  %v1418_v47 = vld [vmem:[%s2639_s1 + $0x760] sm:$0xff]  ;;  %v1433_v49 = vld [vmem:[%s2639_s1 + $0x7d8] sm:$0xff] }
  0x66   : > { %1636 = vmatpush3.msra.mxu1 %v1348_v51  ;;  %1602 = vmatprep.subr.mxu0 %v1331_v52  ;;  %v1385_v50 = vld [vmem:[%s2639_s1 + $0x658] sm:$0xff]  ;;  %v1400_v52 = vld [vmem:[%s2639_s1 + $0x6d0] sm:$0xff] }
  0x67   : > { %1637 = vmatprep.subr.mxu1 %v1363_v53  ;;  %1603 = vmatpush3.msra.mxu0 %v1315_v54  ;;  %v1417_v51 = vld [vmem:[%s2639_s1 + $0x758] sm:$0xff]  ;;  %v1432_v53 = vld [vmem:[%s2639_s1 + $0x7d0] sm:$0xff] }
  0x68   : > { %1638 = vmatpush3.msra.mxu1 %v1347_v55  ;;  %1604 = vmatprep.subr.mxu0 %v1330_v56  ;;  %v1384_v54 = vld [vmem:[%s2639_s1 + $0x650] sm:$0xff]  ;;  %v1399_v56 = vld [vmem:[%s2639_s1 + $0x6c8] sm:$0xff] }
  0x69   : > { %1639 = vmatprep.subr.mxu1 %v1362_v57  ;;  %1605 = vmatpush3.msra.mxu0 %v1314_v58  ;;  %v1416_v55 = vld [vmem:[%s2639_s1 + $0x750] sm:$0xff]  ;;  %v1431_v57 = vld [vmem:[%s2639_s1 + $0x7c8] sm:$0xff] }
  0x6a   : > { %1640 = vmatpush3.msra.mxu1 %v1346_v59  ;;  %1606 = vmatprep.subr.mxu0 %v1329_v60  ;;  %v1383_v58 = vld [vmem:[%s2639_s1 + $0x648] sm:$0xff]  ;;  %v1398_v60 = vld [vmem:[%s2639_s1 + $0x6c0] sm:$0xff] }
  0x6b   : > { %1641 = vmatprep.subr.mxu1 %v1361_v61  ;;  %1607 = vmatpush3.msra.mxu0 %v1313_v62  ;;  %v1415_v59 = vld [vmem:[%s2639_s1 + $0x748] sm:$0xff]  ;;  %v1430_v61 = vld [vmem:[%s2639_s1 + $0x7c0] sm:$0xff] }
  0x6c   : > { %1642 = vmatpush3.msra.mxu1 %v1345_v63  ;;  %1608 = vmatprep.subr.mxu0 %v1328_v0  ;;  %v1382_v62 = vld [vmem:[%s2639_s1 + $0x640] sm:$0xff]  ;;  %v1397_v0 = vld [vmem:[%s2639_s1 + $0x6b8] sm:$0xff] }
  0x6d   : > { %1643 = vmatprep.subr.mxu1 %v1360_v1  ;;  %1609 = vmatpush3.msra.mxu0 %v1312_v10  ;;  %v1414_v63 = vld [vmem:[%s2639_s1 + $0x740] sm:$0xff]  ;;  %v1429_v1 = vld [vmem:[%s2639_s1 + $0x7b8] sm:$0xff]  ;;  %v1379_v10 = vld [vmem:[%s2639_s1 + $0x628] sm:$0xff] }
  0x6e   : > { %1644 = vmatpush3.msra.mxu1 %v1344_v11  ;;  %1610 = vmatprep.subr.mxu0 %v1327_v14  ;;  %v1411_v11 = vld [vmem:[%s2639_s1 + $0x728] sm:$0xff]  ;;  %v1378_v14 = vld [vmem:[%s2639_s1 + $0x620] sm:$0xff] }
  0x6f   : > { %1645 = vmatprep.subr.mxu1 %v1359_v15  ;;  %1611 = vmatpush3.msra.mxu0 %v1311_v18  ;;  %v1410_v15 = vld [vmem:[%s2639_s1 + $0x720] sm:$0xff]  ;;  %v1377_v18 = vld [vmem:[%s2639_s1 + $0x618] sm:$0xff] }
  0x70   : > { %1646 = vmatpush3.msra.mxu1 %v1343_v19  ;;  %1612 = vmatprep.subr.mxu0 %v1326_v24  ;;  %v1409_v19 = vld [vmem:[%s2639_s1 + $0x718] sm:$0xff] }
  0x71   : > { %1647 = vmatprep.subr.mxu1 %v1358_v25  ;;  %1613 = vmatpush3.msra.mxu0 %v1310_v26  ;;  %v891_v24 = vld [vmem:[%s1970_s27 + $0x18] sm:$0xf0]  ;;  %v895_v25 = vld [vmem:[%s1970_s27 + $0x38] sm:$0x3]  ;;  %v888_v26 = vld [vmem:[%s1970_s27] sm:$0xf0] }
  0x72   : > { %811 = vmatprep.mubr.f32.mxu0 %v736_v27  ;;  %1648 = vmatpush3.msra.mxu1 %v1342_v28  ;;  %v892_v27 = vld [vmem:[%s1970_s27 + $0x20] sm:$0x3]  ;;  %v890_v28 = vld [vmem:[%s1970_s27 + $0x10] sm:$0xf0] }
  0x73   : > { %881 = vmatprep.mubr.f32.mxu1 %v742_v29  ;;  %812 = vmatmul.mubr.f32.vlgmr.msra.gmra.mxu0 %v733_v30  ;;  %v894_v29 = vld [vmem:[%s1970_s27 + $0x30] sm:$0x3] }
  0x74   : > { %882 = vmatmul.mubr.f32.vlgmr.msra.gmra.mxu1 %v739_v31  ;;  %1652 = vmatprep.subr.mxu0 %v1405_v32  ;;  %v1376_v30 = vld [vmem:[%s2639_s1 + $0x610] sm:$0xff]  ;;  %v973_v32 = vrot.slane %v889_v22, 4 }
  0x75   : > { %1687 = vmatprep.subr.mxu1 %v1437_v33  ;;  %1653 = vmatpush3.msra.mxu0 %v1389_v34  ;;  %v1408_v31 = vld [vmem:[%s2639_s1 + $0x710] sm:$0xff]  ;;  %v974_v33 = vrot.slane %v893_v23, 4  ;;  %v1391_v34 = vld [vmem:[%s2639_s1 + $0x688] sm:$0xff] }
  0x76   : > { %1688 = vmatpush3.msra.mxu1 %v1421_v35  ;;  %1654 = vmatprep.subr.mxu0 %v1404_v36  ;;  %v1423_v35 = vld [vmem:[%s2639_s1 + $0x788] sm:$0xff]  ;;  %v979_v36 = vrot.slane %v891_v24, 4 }
  0x77   : > { %1689 = vmatprep.subr.mxu1 %v1436_v37  ;;  %1655 = vmatpush3.msra.mxu0 %v1388_v38  ;;  %v980_v37 = vrot.slane %v895_v25, 4  ;;  %v1375_v38 = vld [vmem:[%s2639_s1 + $0x608] sm:$0xff] }
  0x78   : > { %1690 = vmatpush3.msra.mxu1 %v1420_v39  ;;  %1656 = vmatprep.subr.mxu0 %v1403_v40  ;;  %v1407_v39 = vld [vmem:[%s2639_s1 + $0x708] sm:$0xff]  ;;  %v970_v40 = vrot.slane %v888_v26, 4 }
  0x79   : > { %1691 = vmatprep.subr.mxu1 %v1435_v41  ;;  %1657 = vmatpush3.msra.mxu0 %v1387_v42  ;;  %v971_v41 = vrot.slane %v892_v27, 4  ;;  %v976_v42 = vrot.slane %v890_v28, 4 }
  0x7a   : > { %1692 = vmatpush3.msra.mxu1 %v1419_v43  ;;  %1658 = vmatprep.subr.mxu0 %v1402_v44  ;;  %v977_v43 = vrot.slane %v894_v29, 4  ;;  %v1390_v44 = vld [vmem:[%s2639_s1 + $0x680] sm:$0xff] }
  0x7b   : > { %1693 = vmatprep.subr.mxu1 %v1434_v45  ;;  %1659 = vmatpush3.msra.mxu0 %v1386_v46  ;;  %v1422_v45 = vld [vmem:[%s2639_s1 + $0x780] sm:$0xff] }
  0x7c   : > { %1694 = vmatpush3.msra.mxu1 %v1418_v47  ;;  %1660 = vmatprep.subr.mxu0 %v1401_v48  ;;  %v1374_v46 = vld [vmem:[%s2639_s1 + $0x600] sm:$0xff]  ;;  %v975_v47 = vsel %vm969_vm1, %v973_v32, %v974_v33 }
  0x7d   : > { %1695 = vmatprep.subr.mxu1 %v1433_v49  ;;  %1661 = vmatpush3.msra.mxu0 %v1385_v50  ;;  %v1406_v48 = vld [vmem:[%s2639_s1 + $0x700] sm:$0xff]  ;;  %v981_v49 = vsel %vm969_vm1, %v979_v36, %v980_v37  ;;  %v972_v50 = vsel %vm969_vm1, %v970_v40, %v971_v41 }
  0x7e   : > { %1696 = vmatpush3.msra.mxu1 %v1417_v51  ;;  %1662 = vmatprep.subr.mxu0 %v1400_v52  ;;  %v978_v51 = vsel %vm969_vm1, %v976_v42, %v977_v43 }
  0x7f   : > { %1697 = vmatprep.subr.mxu1 %v1432_v53  ;;  %1663 = vmatpush3.msra.mxu0 %v1384_v54 }
  0x80   : > { %1698 = vmatpush3.msra.mxu1 %v1416_v55  ;;  %1664 = vmatprep.subr.mxu0 %v1399_v56 }
  0x81   : > { %1699 = vmatprep.subr.mxu1 %v1431_v57  ;;  %1665 = vmatpush3.msra.mxu0 %v1383_v58 }
  0x82   : > { %1700 = vmatpush3.msra.mxu1 %v1415_v59  ;;  %1666 = vmatprep.subr.mxu0 %v1398_v60 }
  0x83   : > { %1701 = vmatprep.subr.mxu1 %v1430_v61  ;;  %1667 = vmatpush3.msra.mxu0 %v1382_v62 }
  0x84   : > { %1702 = vmatpush3.msra.mxu1 %v1414_v63  ;;  %1668 = vmatprep.subr.mxu0 %v1397_v0 }
  0x85   : > { %1703 = vmatprep.subr.mxu1 %v1429_v1  ;;  %1669 = vmatpush3.msra.mxu0 %v1381_v2 }
  0x86   : > { %1704 = vmatpush3.msra.mxu1 %v1413_v3  ;;  %1670 = vmatprep.subr.mxu0 %v1396_v4 }
  0x87   : > { %1705 = vmatprep.subr.mxu1 %v1428_v5  ;;  %1671 = vmatpush3.msra.mxu0 %v1380_v6 }
  0x88   : > { %1706 = vmatpush3.msra.mxu1 %v1412_v7  ;;  %1672 = vmatprep.subr.mxu0 %v1395_v8 }
  0x89   : > { %1707 = vmatprep.subr.mxu1 %v1427_v9  ;;  %1673 = vmatpush3.msra.mxu0 %v1379_v10 }
  0x8a   : > { %1708 = vmatpush3.msra.mxu1 %v1411_v11  ;;  %1674 = vmatprep.subr.mxu0 %v1394_v12 }
  0x8b   : > { %1709 = vmatprep.subr.mxu1 %v1426_v13  ;;  %1675 = vmatpush3.msra.mxu0 %v1378_v14 }
  0x8c   : > { %1710 = vmatpush3.msra.mxu1 %v1410_v15  ;;  %1676 = vmatprep.subr.mxu0 %v1393_v16 }
  0x8d   : > { %1711 = vmatprep.subr.mxu1 %v1425_v17  ;;  %1677 = vmatpush3.msra.mxu0 %v1377_v18  ;;  %v1438_v18 = vld [vmem:[%s2640_s2] ss:$0 sm:$0xff] }
  0x8e   : > { %1712 = vmatpush3.msra.mxu1 %v1409_v19  ;;  %1678 = vmatprep.subr.mxu0 %v1392_v20 }
  0x8f   : > { %1713 = vmatprep.subr.mxu1 %v1424_v21  ;;  %1679 = vmatpush3.msra.mxu0 %v1376_v30 }
  0x90   : > { %1714 = vmatpush3.msra.mxu1 %v1408_v31  ;;  %1680 = vmatprep.subr.mxu0 %v1391_v34 }
  0x91   : > { %1715 = vmatprep.subr.mxu1 %v1423_v35  ;;  %1681 = vmatpush3.msra.mxu0 %v1375_v38 }
  0x92   : > { %1716 = vmatpush3.msra.mxu1 %v1407_v39  ;;  %1682 = vmatprep.subr.mxu0 %v1390_v44 }
  0x93   : > { %1717 = vmatprep.subr.mxu1 %v1422_v45  ;;  %1683 = vmatpush3.msra.mxu0 %v1374_v46 }
  0x94   : > { %1050 = vmatprep.mubr.f32.mxu0 %v975_v47  ;;  %1718 = vmatpush3.msra.mxu1 %v1406_v48 }
  0x95   : > { %1120 = vmatprep.mubr.f32.mxu1 %v981_v49  ;;  %1051 = vmatmul.mubr.f32.vlgmr.msra.gmra.mxu0 %v972_v50 }
  0x96   : > { %1121 = vmatmul.mubr.f32.vlgmr.msra.gmra.mxu1 %v978_v51 }
  0xef   : > { %v1474_v52 = vpop.f32.mrf.mxu0 }
  0xf0   : > { %v1509_v53 = vpop.f32.mrf.mxu1 }
  0xf1   : > { %v1475_v54 = vpop.f32.mrf.mxu0 }
  0xf2   : > { %v1510_v55 = vpop.f32.mrf.mxu1  ;;  %v1476_v62 = vadd.f32 %v1475_v54, %v1474_v52 }
  0xf3   : > { %v1511_v63 = vadd.f32 %v1510_v55, %v1509_v53 }
  0xf5   : > { %v506_v3 = vadd.f32 %v1511_v63, %v1476_v62 }
 0x111   : > { %v1544_v56 = vpop.f32.mrf.mxu0 }
 0x112   : > { %v1579_v57 = vpop.f32.mrf.mxu1 }
 0x113   : > { %v1545_v58 = vpop.f32.mrf.mxu0 }
 0x114   : > { %v1580_v59 = vpop.f32.mrf.mxu1  ;;  %v1546_v2 = vadd.f32 %v1545_v58, %v1544_v56 }
 0x115   : > { %v1581_v9 = vadd.f32 %v1580_v59, %v1579_v57 }
 0x116   : > { %v576_v6 = vadd.f32 %v1546_v2, %v506_v3 }
 0x118   : > { %v646_v13 = vadd.f32 %v1581_v9, %v576_v6 }
 0x133   : > { %v1614_v60 = vpop.f32.mrf.mxu0 }
 0x134   : > { %v1649_v61 = vpop.f32.mrf.mxu1 }
 0x135   : > { %v1615_v0 = vpop.f32.mrf.mxu0 }
 0x136   : > { %v1650_v1 = vpop.f32.mrf.mxu1  ;;  %v1616_v4 = vadd.f32 %v1615_v0, %v1614_v60 }
 0x137   : > { %v1651_v5 = vadd.f32 %v1650_v1, %v1649_v61 }
 0x139   : > { %v884_v10 = vadd.f32 %v1651_v5, %v1616_v4 }
 0x13b   : > { %v887_v16 = vadd.f32 %v884_v10, %v646_v13 }
 0x155   : > { %v1684_v7 = vpop.f32.mrf.mxu0 }
 0x156   : > { %v1719_v8 = vpop.f32.mrf.mxu1 }
 0x157   : > { %v1685_v11 = vpop.f32.mrf.mxu0 }
 0x158   : > { %v1720_v12 = vpop.f32.mrf.mxu1  ;;  %v1686_v14 = vadd.f32 %v1685_v11, %v1684_v7 }
 0x159   : > { %v1721_v15 = vadd.f32 %v1720_v12, %v1719_v8 }
 0x15b   : > { %v1123_v17 = vadd.f32 %v1721_v15, %v1686_v14 }
 0x15d   : > { %v1126_v19 = vadd.f32 %v1123_v17, %v887_v16 }
 0x15f   : > { %v1134_v20 = vadd.f32 %v1438_v18, %v1126_v19 }
 0x161   : > { %v1135_v21 = vmax.f32 %v1134_v20, 0.0 }
 0x163   : > { %1136 = vst [vmem:[%s219_s25] sm:$0x3f] %v1135_v21 }
 0x164 PF: > { %s13_s14 = sadd.s32 1, %s1768_s14   ;;  %s2642_s12 = smov %s1764_s13 }
 0x165   : > { %p10_p5 = scmp.ge.s32.totalorder %s13_s14, 4   ;;  %s2643_s13 = smov %s2645_s15 }
 0x167   :  { %12 = sbr.rel (!%p10_p5) target bundleno = 2 (0x2), region = 71 }

</bundles_post_ra>
